<compile_context>
chip_gen: v5e
topology: v5e:2x2
jax: 0.10.0
libtpu: 0.0.40
codegen_flags: <defaults>
</compile_context>

<pallas_src>
import functools

import jax
import jax.numpy as jnp
from jax.experimental import pallas as pl
from jax.experimental.pallas import tpu as pltpu

BN_EPS = 1e-5
LANE = 128


def _round_up(x, m):
    return ((x + m - 1) // m) * m


# ----------------------------------------------------------------------------
# Kernels
# ----------------------------------------------------------------------------
def _conv_stats_kernel(cols_ref, w_ref, gamma_ref, beta_ref,
                       y_ref, scale_ref, shift_ref,
                       s1_ref, s2_ref, *, inv_m):
    """Phase A: raw conv tile + per-channel sum / sum-of-squares accumulation.

    On the last grid step the BN affine is folded into (scale, shift):
      scale = gamma * rsqrt(var + eps),  shift = beta - mean * scale.
    """
    i = pl.program_id(0)

    @pl.when(i == 0)
    def _init():
        s1_ref[...] = jnp.zeros_like(s1_ref)
        s2_ref[...] = jnp.zeros_like(s2_ref)

    acc = jnp.dot(cols_ref[...], w_ref[...], preferred_element_type=jnp.float32)
    y_ref[...] = acc
    s1_ref[...] += jnp.sum(acc, axis=0, keepdims=True)
    s2_ref[...] += jnp.sum(acc * acc, axis=0, keepdims=True)

    @pl.when(i == pl.num_programs(0) - 1)
    def _finalize():
        mean = s1_ref[...] * inv_m
        var = jnp.maximum(s2_ref[...] * inv_m - mean * mean, 0.0)
        scale = gamma_ref[...] * jax.lax.rsqrt(var + BN_EPS)
        scale_ref[...] = scale
        shift_ref[...] = beta_ref[...] - mean * scale


def _conv_stats_dual_kernel(cols_ref, w_ref, gamma_ref, beta_ref,
                            xd_ref, wd_ref, gammad_ref, betad_ref,
                            y_ref, d_ref, scale_ref, shift_ref,
                            scaled_ref, shiftd_ref,
                            s1_ref, s2_ref, t1_ref, t2_ref, *, inv_m):
    """Phase A for conv2 fused with the 1x1 downsample conv (both + BN stats).

    NOTE: the downsample conv bias is dropped on purpose: a per-channel
    constant added before a training-mode BatchNorm is exactly cancelled by
    the batch-mean subtraction, so it has no effect on the block output.
    """
    i = pl.program_id(0)

    @pl.when(i == 0)
    def _init():
        s1_ref[...] = jnp.zeros_like(s1_ref)
        s2_ref[...] = jnp.zeros_like(s2_ref)
        t1_ref[...] = jnp.zeros_like(t1_ref)
        t2_ref[...] = jnp.zeros_like(t2_ref)

    acc = jnp.dot(cols_ref[...], w_ref[...], preferred_element_type=jnp.float32)
    dwn = jnp.dot(xd_ref[...], wd_ref[...], preferred_element_type=jnp.float32)
    y_ref[...] = acc
    d_ref[...] = dwn
    s1_ref[...] += jnp.sum(acc, axis=0, keepdims=True)
    s2_ref[...] += jnp.sum(acc * acc, axis=0, keepdims=True)
    t1_ref[...] += jnp.sum(dwn, axis=0, keepdims=True)
    t2_ref[...] += jnp.sum(dwn * dwn, axis=0, keepdims=True)

    @pl.when(i == pl.num_programs(0) - 1)
    def _finalize():
        mean = s1_ref[...] * inv_m
        var = jnp.maximum(s2_ref[...] * inv_m - mean * mean, 0.0)
        scale = gamma_ref[...] * jax.lax.rsqrt(var + BN_EPS)
        scale_ref[...] = scale
        shift_ref[...] = beta_ref[...] - mean * scale

        meand = t1_ref[...] * inv_m
        vard = jnp.maximum(t2_ref[...] * inv_m - meand * meand, 0.0)
        scd = gammad_ref[...] * jax.lax.rsqrt(vard + BN_EPS)
        scaled_ref[...] = scd
        shiftd_ref[...] = betad_ref[...] - meand * scd


def _bn_relu_kernel(y_ref, scale_ref, shift_ref, out_ref):
    out_ref[...] = jnp.maximum(
        y_ref[...] * scale_ref[...] + shift_ref[...], 0.0).astype(out_ref.dtype)


def _bn_add_relu_kernel(y_ref, res_ref, scale_ref, shift_ref, out_ref):
    main = y_ref[...] * scale_ref[...] + shift_ref[...]
    out_ref[...] = jnp.maximum(
        main + res_ref[...].astype(jnp.float32), 0.0).astype(out_ref.dtype)


def _dual_bn_add_relu_kernel(y_ref, d_ref, scale_ref, shift_ref,
                             scaled_ref, shiftd_ref, out_ref):
    main = y_ref[...] * scale_ref[...] + shift_ref[...]
    down = d_ref[...] * scaled_ref[...] + shiftd_ref[...]
    out_ref[...] = jnp.maximum(main + down, 0.0).astype(out_ref.dtype)


# ----------------------------------------------------------------------------
# Plain-JAX glue: im2col, padding, parameter init
# ----------------------------------------------------------------------------
def _im2col_flat(x_nhwc, k, stride, pad):
    """Return (M, k*k*C) im2col matrix (taps folded into K) and (Ho, Wo)."""
    N, H, W, C = x_nhwc.shape
    xp = jnp.pad(x_nhwc, ((0, 0), (pad, pad), (pad, pad), (0, 0)))
    Ho = (H + 2 * pad - k) // stride + 1
    Wo = (W + 2 * pad - k) // stride + 1
    cols = []
    for dy in range(k):
        for dx in range(k):
            sl = xp[:, dy:dy + stride * (Ho - 1) + 1:stride,
                       dx:dx + stride * (Wo - 1) + 1:stride, :]
            cols.append(sl.reshape(N * Ho * Wo, C))
    return jnp.concatenate(cols, axis=-1), Ho, Wo


def _pad2d(a, rows, cols):
    return jnp.pad(a, ((0, rows - a.shape[0]), (0, cols - a.shape[1])))


def init_basic_block_params(key, in_planes, planes, kernel_size=3, stride=1):
    ks = jax.random.split(key, 4)
    params = {
        "w1": 0.1 * jax.random.normal(
            ks[0], (kernel_size, kernel_size, in_planes, planes), jnp.float32),
        "g1": jnp.ones((1, planes), jnp.float32),
        "b1": jnp.zeros((1, planes), jnp.float32),
        "w2": 0.1 * jax.random.normal(
            ks[1], (kernel_size, kernel_size, planes, planes), jnp.float32),
        "g2": jnp.ones((1, planes), jnp.float32),
        "b2": jnp.zeros((1, planes), jnp.float32),
    }
    if stride != 1 or in_planes != planes:
        params["wd"] = 0.1 * jax.random.normal(
            ks[2], (in_planes, planes), jnp.float32)   # 1x1 conv weight (Cin, P)
        params["bd"] = 0.1 * jax.random.normal(
            ks[3], (1, planes), jnp.float32)           # 1x1 conv bias (cancelled by BN)
        params["gd"] = jnp.ones((1, planes), jnp.float32)
        params["betad"] = jnp.zeros((1, planes), jnp.float32)
    return params


# ----------------------------------------------------------------------------
# Forward wrapper
# ----------------------------------------------------------------------------
def basic_block_forward(params, x_nchw, *, kernel_size=3, stride=1,
                        tile_m=512, compute_dtype=jnp.bfloat16):
    x = jnp.transpose(x_nchw, (0, 2, 3, 1)).astype(jnp.float32)   # NCHW -> NHWC
    N, H, W, Cin = x.shape
    P = params["g1"].shape[-1]
    Pp = _round_up(P, LANE)               # lane-dense channel padding
    kk = kernel_size * kernel_size
    pad = 1                               # the reference module hardcodes padding=1

    row_blk = lambda tm, c: pl.BlockSpec((tm, c), lambda i: (i, 0))
    bcast_blk = lambda c: pl.BlockSpec((1, c), lambda i: (0, 0))
    full_blk = lambda r, c: pl.BlockSpec((r, c), lambda i: (0, 0))
    arb = pltpu.CompilerParams(dimension_semantics=("arbitrary",))
    par = pltpu.CompilerParams(dimension_semantics=("parallel",))

    # ------------------- conv1 + bn1 + relu ---------------------------------
    cols1, Ho, Wo = _im2col_flat(x, kernel_size, stride, pad)
    M1 = N * Ho * Wo
    K1 = kk * Cin
    tm1 = min(_round_up(tile_m, 8), _round_up(M1, 8))
    nt1 = -(-M1 // tm1)
    Mp1 = nt1 * tm1

    cols1 = _pad2d(cols1, Mp1, K1).astype(compute_dtype)
    w1 = _pad2d(params["w1"].reshape(K1, P), K1, Pp).astype(compute_dtype)
    g1 = _pad2d(params["g1"], 1, Pp)
    b1 = _pad2d(params["b1"], 1, Pp)

    y1_raw, sc1, sh1 = pl.pallas_call(
        functools.partial(_conv_stats_kernel, inv_m=1.0 / M1),
        grid=(nt1,),
        in_specs=[row_blk(tm1, K1), full_blk(K1, Pp), bcast_blk(Pp), bcast_blk(Pp)],
        out_specs=[row_blk(tm1, Pp), bcast_blk(Pp), bcast_blk(Pp)],
        out_shape=[jax.ShapeDtypeStruct((Mp1, Pp), jnp.float32),
                   jax.ShapeDtypeStruct((1, Pp), jnp.float32),
                   jax.ShapeDtypeStruct((1, Pp), jnp.float32)],
        scratch_shapes=[pltpu.VMEM((1, Pp), jnp.float32),
                        pltpu.VMEM((1, Pp), jnp.float32)],
        compiler_params=arb,
    )(cols1, w1, g1, b1)

    y1 = pl.pallas_call(
        _bn_relu_kernel,
        grid=(nt1,),
        in_specs=[row_blk(tm1, Pp), bcast_blk(Pp), bcast_blk(Pp)],
        out_specs=row_blk(tm1, Pp),
        out_shape=jax.ShapeDtypeStruct((Mp1, Pp), compute_dtype),
        compiler_params=par,
    )(y1_raw, sc1, sh1)

    y1_nhwc = y1[:M1, :P].reshape(N, Ho, Wo, P)

    # ------------------- conv2 + bn2 + shortcut + relu ----------------------
    cols2, Ho2, Wo2 = _im2col_flat(y1_nhwc, kernel_size, 1, pad)
    M2 = N * Ho2 * Wo2
    K2 = kk * P
    tm2 = min(_round_up(tile_m, 8), _round_up(M2, 8))
    nt2 = -(-M2 // tm2)
    Mp2 = nt2 * tm2

    cols2 = _pad2d(cols2, Mp2, K2).astype(compute_dtype)
    w2 = _pad2d(params["w2"].reshape(K2, P), K2, Pp).astype(compute_dtype)
    g2 = _pad2d(params["g2"], 1, Pp)
    b2 = _pad2d(params["b2"], 1, Pp)

    if "wd" in params:
        # Downsample shortcut: 1x1 strided conv + BN (training stats), fused
        # into the same phase-A / phase-B pallas_calls as conv2.
        xd = x[:, ::stride, ::stride, :].reshape(-1, Cin)
        xd = _pad2d(xd, Mp2, Cin).astype(compute_dtype)
        wd = _pad2d(params["wd"], Cin, Pp).astype(compute_dtype)
        gd = _pad2d(params["gd"], 1, Pp)
        bd = _pad2d(params["betad"], 1, Pp)
        # params["bd"] (1x1-conv bias) intentionally unused: cancelled by BN.

        y2_raw, d_raw, sc2, sh2, scd, shd = pl.pallas_call(
            functools.partial(_conv_stats_dual_kernel, inv_m=1.0 / M2),
            grid=(nt2,),
            in_specs=[row_blk(tm2, K2), full_blk(K2, Pp),
                      bcast_blk(Pp), bcast_blk(Pp),
                      row_blk(tm2, Cin), full_blk(Cin, Pp),
                      bcast_blk(Pp), bcast_blk(Pp)],
            out_specs=[row_blk(tm2, Pp), row_blk(tm2, Pp),
                       bcast_blk(Pp), bcast_blk(Pp),
                       bcast_blk(Pp), bcast_blk(Pp)],
            out_shape=[jax.ShapeDtypeStruct((Mp2, Pp), jnp.float32),
                       jax.ShapeDtypeStruct((Mp2, Pp), jnp.float32),
                       jax.ShapeDtypeStruct((1, Pp), jnp.float32),
                       jax.ShapeDtypeStruct((1, Pp), jnp.float32),
                       jax.ShapeDtypeStruct((1, Pp), jnp.float32),
                       jax.ShapeDtypeStruct((1, Pp), jnp.float32)],
            scratch_shapes=[pltpu.VMEM((1, Pp), jnp.float32),
                            pltpu.VMEM((1, Pp), jnp.float32),
                            pltpu.VMEM((1, Pp), jnp.float32),
                            pltpu.VMEM((1, Pp), jnp.float32)],
            compiler_params=arb,
        )(cols2, w2, g2, b2, xd, wd, gd, bd)

        out = pl.pallas_call(
            _dual_bn_add_relu_kernel,
            grid=(nt2,),
            in_specs=[row_blk(tm2, Pp), row_blk(tm2, Pp),
                      bcast_blk(Pp), bcast_blk(Pp),
                      bcast_blk(Pp), bcast_blk(Pp)],
            out_specs=row_blk(tm2, Pp),
            out_shape=jax.ShapeDtypeStruct((Mp2, Pp), jnp.float32),
            compiler_params=par,
        )(y2_raw, d_raw, sc2, sh2, scd, shd)
    else:
        # Identity shortcut (stride == 1 and Cin == P).
        res = _pad2d(x.reshape(-1, Cin), Mp2, Pp)          # stays f32

        y2_raw, sc2, sh2 = pl.pallas_call(
            functools.partial(_conv_stats_kernel, inv_m=1.0 / M2),
            grid=(nt2,),
            in_specs=[row_blk(tm2, K2), full_blk(K2, Pp),
                      bcast_blk(Pp), bcast_blk(Pp)],
            out_specs=[row_blk(tm2, Pp), bcast_blk(Pp), bcast_blk(Pp)],
            out_shape=[jax.ShapeDtypeStruct((Mp2, Pp), jnp.float32),
                       jax.ShapeDtypeStruct((1, Pp), jnp.float32),
                       jax.ShapeDtypeStruct((1, Pp), jnp.float32)],
            scratch_shapes=[pltpu.VMEM((1, Pp), jnp.float32),
                            pltpu.VMEM((1, Pp), jnp.float32)],
            compiler_params=arb,
        )(cols2, w2, g2, b2)

        out = pl.pallas_call(
            _bn_add_relu_kernel,
            grid=(nt2,),
            in_specs=[row_blk(tm2, Pp), row_blk(tm2, Pp),
                      bcast_blk(Pp), bcast_blk(Pp)],
            out_specs=row_blk(tm2, Pp),
            out_shape=jax.ShapeDtypeStruct((Mp2, Pp), jnp.float32),
            compiler_params=par,
        )(y2_raw, res, sc2, sh2)

    out = out[:M2, :P].reshape(N, Ho2, Wo2, P)
    return jnp.transpose(out, (0, 3, 1, 2))                # NHWC -> NCHW


# ----------------------------------------------------------------------------
# Plain-JAX reference (for self-validation)
# ----------------------------------------------------------------------------
def _reference_forward(params, x_nchw, kernel_size=3, stride=1):
    x = x_nchw.astype(jnp.float32)

    def conv(v, w_hwio, s, p):
        return jax.lax.conv_general_dilated(
            v, w_hwio, window_strides=(s, s), padding=[(p, p), (p, p)],
            dimension_numbers=("NCHW", "HWIO", "NCHW"),
            precision=jax.lax.Precision.HIGHEST)

    def bn(v, g, b):
        mean = jnp.mean(v, axis=(0, 2, 3), keepdims=True)
        var = jnp.mean((v - mean) ** 2, axis=(0, 2, 3), keepdims=True)
        return ((v - mean) * jax.lax.rsqrt(var + BN_EPS)
                * g.reshape(1, -1, 1, 1) + b.reshape(1, -1, 1, 1))

    y = jax.nn.relu(bn(conv(x, params["w1"], stride, 1), params["g1"], params["b1"]))
    y = bn(conv(y, params["w2"], 1, 1), params["g2"], params["b2"])
    if "wd" in params:
        wd = params["wd"].reshape(1, 1, *params["wd"].shape)
        d = conv(x, wd, stride, 0) + params["bd"].reshape(1, -1, 1, 1)
        d = bn(d, params["gd"], params["betad"])
    else:
        d = x
    return jax.nn.relu(y + d)


# ----------------------------------------------------------------------------
if __name__ == "__main__":
    key = jax.random.PRNGKey(0)
    k1, k2, k3, k4 = jax.random.split(key, 4)

    N, H, W = 2, 16, 16

    # ---- config A: in_planes != planes -> downsample (1x1 conv + BN) path ---
    in_planes, planes, stride = 4, 8, 1
    x_a = jax.random.normal(k2, (N, in_planes, H, W), jnp.float32)
    params_a = init_basic_block_params(k1, in_planes, planes, 3, stride)
    ref_a = jax.block_until_ready(_reference_forward(params_a, x_a, 3, stride))

    fwd_a_f32 = jax.jit(lambda p, xx: basic_block_forward(
        p, xx, kernel_size=3, stride=stride, tile_m=128,
        compute_dtype=jnp.float32))
    out_a_f32 = jax.block_until_ready(fwd_a_f32(params_a, x_a))
    assert out_a_f32.shape == (N, planes, H, W)
    assert bool(jnp.all(out_a_f32 >= 0.0))
    assert bool(jnp.allclose(out_a_f32, ref_a, atol=1e-2, rtol=1e-2))

    fwd_a_bf16 = jax.jit(lambda p, xx: basic_block_forward(
        p, xx, kernel_size=3, stride=stride, tile_m=128,
        compute_dtype=jnp.bfloat16))
    out_a_bf16 = jax.block_until_ready(fwd_a_bf16(params_a, x_a))
    assert out_a_bf16.shape == (N, planes, H, W)
    assert bool(jnp.all(out_a_bf16 >= 0.0))
    assert bool(jnp.allclose(out_a_bf16, ref_a, atol=0.3, rtol=0.1))

    # ---- config B: in_planes == planes, stride 1 -> identity shortcut ------
    x_b = jax.random.normal(k4, (N, planes, H, W), jnp.float32)
    params_b = init_basic_block_params(k3, planes, planes, 3, 1)
    ref_b = jax.block_until_ready(_reference_forward(params_b, x_b, 3, 1))

    fwd_b_f32 = jax.jit(lambda p, xx: basic_block_forward(
        p, xx, kernel_size=3, stride=1, tile_m=128,
        compute_dtype=jnp.float32))
    out_b_f32 = jax.block_until_ready(fwd_b_f32(params_b, x_b))
    assert out_b_f32.shape == (N, planes, H, W)
    assert bool(jnp.all(out_b_f32 >= 0.0))
    assert bool(jnp.allclose(out_b_f32, ref_b, atol=1e-2, rtol=1e-2))

    print("KERNEL_OK")
</pallas_src>

<mosaic_0001>
module attributes {stable_mosaic.version = 11 : i64} {
  func.func @_conv_stats_kernel(%arg0: i32, %arg1: memref<128x36xf32, #tpu.memory_space<vmem>>, %arg2: memref<36x128xf32, #tpu.memory_space<vmem>>, %arg3: memref<1x128xf32, #tpu.memory_space<vmem>>, %arg4: memref<1x128xf32, #tpu.memory_space<vmem>>, %arg5: memref<128x128xf32, #tpu.memory_space<vmem>>, %arg6: memref<1x128xf32, #tpu.memory_space<vmem>>, %arg7: memref<1x128xf32, #tpu.memory_space<vmem>>, %arg8: memref<1x128xf32, #tpu.memory_space<vmem>>, %arg9: memref<1x128xf32, #tpu.memory_space<vmem>>) attributes {dimension_semantics = [#tpu.dimension_semantics<arbitrary>], iteration_bounds = array<i64: 4>, scalar_prefetch = 0 : i64, scratch_operands = 2 : i64, tpu.core_type = #tpu.core_type<tc>, window_params = [{transform_indices = @transform_0, window_bounds = array<i64: 128, 36>}, {pipeline_mode = #tpu.pipeline_mode<synchronous>, transform_indices = @transform_1, window_bounds = array<i64: 36, 128>}, {pipeline_mode = #tpu.pipeline_mode<synchronous>, transform_indices = @transform_2, window_bounds = array<i64: 1, 128>}, {pipeline_mode = #tpu.pipeline_mode<synchronous>, transform_indices = @transform_3, window_bounds = array<i64: 1, 128>}, {transform_indices = @transform_4, window_bounds = array<i64: 128, 128>}, {pipeline_mode = #tpu.pipeline_mode<synchronous>, transform_indices = @transform_5, window_bounds = array<i64: 1, 128>}, {pipeline_mode = #tpu.pipeline_mode<synchronous>, transform_indices = @transform_6, window_bounds = array<i64: 1, 128>}]} {
    %c0_i32 = arith.constant 0 : i32
    %0 = arith.cmpi eq, %arg0, %c0_i32 : i32
    %1 = arith.extui %0 : i1 to i32
    %c0_i32_0 = arith.constant 0 : i32
    %2 = arith.cmpi ne, %1, %c0_i32_0 : i32
    scf.if %2 {
      %cst_17 = arith.constant 0.000000e+00 : f32
      %21 = vector.broadcast %cst_17 : f32 to vector<1x128xf32>
      %c0_18 = arith.constant 0 : index
      %c0_19 = arith.constant 0 : index
      %22 = vector.load %arg8[%c0_18, %c0_19] : memref<1x128xf32, #tpu.memory_space<vmem>>, vector<1x128xf32>
      tpu.vector_store %arg8[%c0_18, %c0_19], %21 {strides = array<i32>} : memref<1x128xf32, #tpu.memory_space<vmem>>, vector<1x128xf32>,
      %cst_20 = arith.constant 0.000000e+00 : f32
      %23 = vector.broadcast %cst_20 : f32 to vector<1x128xf32>
      %c0_21 = arith.constant 0 : index
      %c0_22 = arith.constant 0 : index
      %24 = vector.load %arg9[%c0_21, %c0_22] : memref<1x128xf32, #tpu.memory_space<vmem>>, vector<1x128xf32>
      tpu.vector_store %arg9[%c0_21, %c0_22], %23 {strides = array<i32>} : memref<1x128xf32, #tpu.memory_space<vmem>>, vector<1x128xf32>,
    } else {
    }
    %c0 = arith.constant 0 : index
    %c0_1 = arith.constant 0 : index
    %3 = vector.load %arg1[%c0, %c0_1] : memref<128x36xf32, #tpu.memory_space<vmem>>, vector<128x36xf32>
    %c0_2 = arith.constant 0 : index
    %c0_3 = arith.constant 0 : index
    %4 = vector.load %arg2[%c0_2, %c0_3] : memref<36x128xf32, #tpu.memory_space<vmem>>, vector<36x128xf32>
    %cst = arith.constant dense<0.000000e+00> : vector<128x128xf32>
    %5 = tpu.matmul %3, %4, %cst {dimension_numbers = #tpu.dot_dimension_numbers<[1], [0], [0], [1], [0, 0, 1, 1], [], []>} : vector<128x36xf32>, vector<36x128xf32>, vector<128x128xf32> -> vector<128x128xf32>
    %c0_4 = arith.constant 0 : index
    %c0_5 = arith.constant 0 : index
    %6 = vector.load %arg5[%c0_4, %c0_5] : memref<128x128xf32, #tpu.memory_space<vmem>>, vector<128x128xf32>
    tpu.vector_store %arg5[%c0_4, %c0_5], %5 {strides = array<i32>} : memref<128x128xf32, #tpu.memory_space<vmem>>, vector<128x128xf32>,
    %c0_6 = arith.constant 0 : index
    %c0_7 = arith.constant 0 : index
    %7 = vector.load %arg8[%c0_6, %c0_7] : memref<1x128xf32, #tpu.memory_space<vmem>>, vector<1x128xf32>
    %cst_8 = arith.constant dense<0.000000e+00> : vector<128xf32>
    %8 = vector.multi_reduction <add>, %5, %cst_8 [0] : vector<128x128xf32> to vector<128xf32>
    %9 = vector.shape_cast %8 : vector<128xf32> to vector<1x128xf32>
    %10 = arith.addf %7, %9 : vector<1x128xf32>
    %c0_9 = arith.constant 0 : index
    %c0_10 = arith.constant 0 : index
    %11 = vector.load %arg8[%c0_9, %c0_10] : memref<1x128xf32, #tpu.memory_space<vmem>>, vector<1x128xf32>
    tpu.vector_store %arg8[%c0_9, %c0_10], %10 {strides = array<i32>} : memref<1x128xf32, #tpu.memory_space<vmem>>, vector<1x128xf32>,
    %c0_11 = arith.constant 0 : index
    %c0_12 = arith.constant 0 : index
    %12 = vector.load %arg9[%c0_11, %c0_12] : memref<1x128xf32, #tpu.memory_space<vmem>>, vector<1x128xf32>
    %13 = arith.mulf %5, %5 : vector<128x128xf32>
    %cst_13 = arith.constant dense<0.000000e+00> : vector<128xf32>
    %14 = vector.multi_reduction <add>, %13, %cst_13 [0] : vector<128x128xf32> to vector<128xf32>
    %15 = vector.shape_cast %14 : vector<128xf32> to vector<1x128xf32>
    %16 = arith.addf %12, %15 : vector<1x128xf32>
    %c0_14 = arith.constant 0 : index
    %c0_15 = arith.constant 0 : index
    %17 = vector.load %arg9[%c0_14, %c0_15] : memref<1x128xf32, #tpu.memory_space<vmem>>, vector<1x128xf32>
    tpu.vector_store %arg9[%c0_14, %c0_15], %16 {strides = array<i32>} : memref<1x128xf32, #tpu.memory_space<vmem>>, vector<1x128xf32>,
    %c3_i32 = arith.constant 3 : i32
    %18 = arith.cmpi eq, %arg0, %c3_i32 : i32
    %19 = arith.extui %18 : i1 to i32
    %c0_i32_16 = arith.constant 0 : i32
    %20 = arith.cmpi ne, %19, %c0_i32_16 : i32
    scf.if %20 {
      %c0_17 = arith.constant 0 : index
      %c0_18 = arith.constant 0 : index
      %21 = vector.load %arg8[%c0_17, %c0_18] : memref<1x128xf32, #tpu.memory_space<vmem>>, vector<1x128xf32>
      %cst_19 = arith.constant 0.001953125 : f32
      %22 = vector.broadcast %cst_19 : f32 to vector<1x128xf32>
      %23 = arith.mulf %21, %22 : vector<1x128xf32>
      %c0_20 = arith.constant 0 : index
      %c0_21 = arith.constant 0 : index
      %24 = vector.load %arg9[%c0_20, %c0_21] : memref<1x128xf32, #tpu.memory_space<vmem>>, vector<1x128xf32>
      %cst_22 = arith.constant 0.001953125 : f32
      %25 = vector.broadcast %cst_22 : f32 to vector<1x128xf32>
      %26 = arith.mulf %24, %25 : vector<1x128xf32>
      %27 = arith.mulf %23, %23 : vector<1x128xf32>
      %28 = arith.subf %26, %27 : vector<1x128xf32>
      %cst_23 = arith.constant 0.000000e+00 : f32
      %29 = vector.broadcast %cst_23 : f32 to vector<1x128xf32>
      %30 = arith.maximumf %28, %29 : vector<1x128xf32>
      %c0_24 = arith.constant 0 : index
      %c0_25 = arith.constant 0 : index
      %31 = vector.load %arg3[%c0_24, %c0_25] : memref<1x128xf32, #tpu.memory_space<vmem>>, vector<1x128xf32>
      %cst_26 = arith.constant 9.99999974E-6 : f32
      %32 = vector.broadcast %cst_26 : f32 to vector<1x128xf32>
      %33 = arith.addf %30, %32 : vector<1x128xf32>
      %34 = math.rsqrt %33 : vector<1x128xf32>
      %35 = arith.mulf %31, %34 : vector<1x128xf32>
      %c0_27 = arith.constant 0 : index
      %c0_28 = arith.constant 0 : index
      %36 = vector.load %arg6[%c0_27, %c0_28] : memref<1x128xf32, #tpu.memory_space<vmem>>, vector<1x128xf32>
      tpu.vector_store %arg6[%c0_27, %c0_28], %35 {strides = array<i32>} : memref<1x128xf32, #tpu.memory_space<vmem>>, vector<1x128xf32>,
      %c0_29 = arith.constant 0 : index
      %c0_30 = arith.constant 0 : index
      %37 = vector.load %arg4[%c0_29, %c0_30] : memref<1x128xf32, #tpu.memory_space<vmem>>, vector<1x128xf32>
      %38 = arith.mulf %23, %35 : vector<1x128xf32>
      %39 = arith.subf %37, %38 : vector<1x128xf32>
      %c0_31 = arith.constant 0 : index
      %c0_32 = arith.constant 0 : index
      %40 = vector.load %arg7[%c0_31, %c0_32] : memref<1x128xf32, #tpu.memory_space<vmem>>, vector<1x128xf32>
      tpu.vector_store %arg7[%c0_31, %c0_32], %39 {strides = array<i32>} : memref<1x128xf32, #tpu.memory_space<vmem>>, vector<1x128xf32>,
    } else {
    }
    return
  }
  func.func @transform_0(%arg0: i32) -> (i32, i32) {
    %c0_i32 = arith.constant 0 : i32
    %c0_i32_0 = arith.constant 0 : i32
    return %arg0, %c0_i32 : i32, i32
  }
  func.func @transform_1(%arg0: i32) -> (i32, i32) {
    %c0_i32 = arith.constant 0 : i32
    %c0_i32_0 = arith.constant 0 : i32
    %c0_i32_1 = arith.constant 0 : i32
    return %c0_i32, %c0_i32_0 : i32, i32
  }
  func.func @transform_2(%arg0: i32) -> (i32, i32) {
    %c0_i32 = arith.constant 0 : i32
    %c0_i32_0 = arith.constant 0 : i32
    %c0_i32_1 = arith.constant 0 : i32
    return %c0_i32, %c0_i32_0 : i32, i32
  }
  func.func @transform_3(%arg0: i32) -> (i32, i32) {
    %c0_i32 = arith.constant 0 : i32
    %c0_i32_0 = arith.constant 0 : i32
    %c0_i32_1 = arith.constant 0 : i32
    return %c0_i32, %c0_i32_0 : i32, i32
  }
  func.func @transform_4(%arg0: i32) -> (i32, i32) {
    %c0_i32 = arith.constant 0 : i32
    %c0_i32_0 = arith.constant 0 : i32
    return %arg0, %c0_i32 : i32, i32
  }
  func.func @transform_5(%arg0: i32) -> (i32, i32) {
    %c0_i32 = arith.constant 0 : i32
    %c0_i32_0 = arith.constant 0 : i32
    %c0_i32_1 = arith.constant 0 : i32
    return %c0_i32, %c0_i32_0 : i32, i32
  }
  func.func @transform_6(%arg0: i32) -> (i32, i32) {
    %c0_i32 = arith.constant 0 : i32
    %c0_i32_0 = arith.constant 0 : i32
    %c0_i32_1 = arith.constant 0 : i32
    return %c0_i32, %c0_i32_0 : i32, i32
  }
}

module attributes {stable_mosaic.version = 11 : i64} {
  func.func @_bn_relu_kernel(%arg0: i32, %arg1: memref<128x128xf32, #tpu.memory_space<vmem>>, %arg2: memref<1x128xf32, #tpu.memory_space<vmem>>, %arg3: memref<1x128xf32, #tpu.memory_space<vmem>>, %arg4: memref<128x128xf32, #tpu.memory_space<vmem>>) attributes {dimension_semantics = [#tpu.dimension_semantics<parallel>], iteration_bounds = array<i64: 4>, scalar_prefetch = 0 : i64, scratch_operands = 0 : i64, tpu.core_type = #tpu.core_type<tc>, window_params = [{transform_indices = @transform_0, window_bounds = array<i64: 128, 128>}, {pipeline_mode = #tpu.pipeline_mode<synchronous>, transform_indices = @transform_1, window_bounds = array<i64: 1, 128>}, {pipeline_mode = #tpu.pipeline_mode<synchronous>, transform_indices = @transform_2, window_bounds = array<i64: 1, 128>}, {transform_indices = @transform_3, window_bounds = array<i64: 128, 128>}]} {
    %c0 = arith.constant 0 : index
    %c0_0 = arith.constant 0 : index
    %0 = vector.load %arg1[%c0, %c0_0] : memref<128x128xf32, #tpu.memory_space<vmem>>, vector<128x128xf32>
    %c0_1 = arith.constant 0 : index
    %c0_2 = arith.constant 0 : index
    %1 = vector.load %arg2[%c0_1, %c0_2] : memref<1x128xf32, #tpu.memory_space<vmem>>, vector<1x128xf32>
    %2 = vector.broadcast %1 : vector<1x128xf32> to vector<128x128xf32>
    %3 = arith.mulf %0, %2 : vector<128x128xf32>
    %c0_3 = arith.constant 0 : index
    %c0_4 = arith.constant 0 : index
    %4 = vector.load %arg3[%c0_3, %c0_4] : memref<1x128xf32, #tpu.memory_space<vmem>>, vector<1x128xf32>
    %5 = vector.broadcast %4 : vector<1x128xf32> to vector<128x128xf32>
    %6 = arith.addf %3, %5 : vector<128x128xf32>
    %cst = arith.constant 0.000000e+00 : f32
    %7 = vector.broadcast %cst : f32 to vector<128x128xf32>
    %8 = arith.maximumf %6, %7 : vector<128x128xf32>
    %c0_5 = arith.constant 0 : index
    %c0_6 = arith.constant 0 : index
    %9 = vector.load %arg4[%c0_5, %c0_6] : memref<128x128xf32, #tpu.memory_space<vmem>>, vector<128x128xf32>
    tpu.vector_store %arg4[%c0_5, %c0_6], %8 {strides = array<i32>} : memref<128x128xf32, #tpu.memory_space<vmem>>, vector<128x128xf32>,
    return
  }
  func.func @transform_0(%arg0: i32) -> (i32, i32) {
    %c0_i32 = arith.constant 0 : i32
    %c0_i32_0 = arith.constant 0 : i32
    return %arg0, %c0_i32 : i32, i32
  }
  func.func @transform_1(%arg0: i32) -> (i32, i32) {
    %c0_i32 = arith.constant 0 : i32
    %c0_i32_0 = arith.constant 0 : i32
    %c0_i32_1 = arith.constant 0 : i32
    return %c0_i32, %c0_i32_0 : i32, i32
  }
  func.func @transform_2(%arg0: i32) -> (i32, i32) {
    %c0_i32 = arith.constant 0 : i32
    %c0_i32_0 = arith.constant 0 : i32
    %c0_i32_1 = arith.constant 0 : i32
    return %c0_i32, %c0_i32_0 : i32, i32
  }
  func.func @transform_3(%arg0: i32) -> (i32, i32) {
    %c0_i32 = arith.constant 0 : i32
    %c0_i32_0 = arith.constant 0 : i32
    return %arg0, %c0_i32 : i32, i32
  }
}

module attributes {stable_mosaic.version = 11 : i64} {
  func.func @_conv_stats_dual_kernel(%arg0: i32, %arg1: memref<128x72xf32, #tpu.memory_space<vmem>>, %arg2: memref<72x128xf32, #tpu.memory_space<vmem>>, %arg3: memref<1x128xf32, #tpu.memory_space<vmem>>, %arg4: memref<1x128xf32, #tpu.memory_space<vmem>>, %arg5: memref<128x4xf32, #tpu.memory_space<vmem>>, %arg6: memref<4x128xf32, #tpu.memory_space<vmem>>, %arg7: memref<1x128xf32, #tpu.memory_space<vmem>>, %arg8: memref<1x128xf32, #tpu.memory_space<vmem>>, %arg9: memref<128x128xf32, #tpu.memory_space<vmem>>, %arg10: memref<128x128xf32, #tpu.memory_space<vmem>>, %arg11: memref<1x128xf32, #tpu.memory_space<vmem>>, %arg12: memref<1x128xf32, #tpu.memory_space<vmem>>, %arg13: memref<1x128xf32, #tpu.memory_space<vmem>>, %arg14: memref<1x128xf32, #tpu.memory_space<vmem>>, %arg15: memref<1x128xf32, #tpu.memory_space<vmem>>, %arg16: memref<1x128xf32, #tpu.memory_space<vmem>>, %arg17: memref<1x128xf32, #tpu.memory_space<vmem>>, %arg18: memref<1x128xf32, #tpu.memory_space<vmem>>) attributes {dimension_semantics = [#tpu.dimension_semantics<arbitrary>], iteration_bounds = array<i64: 4>, scalar_prefetch = 0 : i64, scratch_operands = 4 : i64, tpu.core_type = #tpu.core_type<tc>, window_params = [{transform_indices = @transform_0, window_bounds = array<i64: 128, 72>}, {pipeline_mode = #tpu.pipeline_mode<synchronous>, transform_indices = @transform_1, window_bounds = array<i64: 72, 128>}, {pipeline_mode = #tpu.pipeline_mode<synchronous>, transform_indices = @transform_2, window_bounds = array<i64: 1, 128>}, {pipeline_mode = #tpu.pipeline_mode<synchronous>, transform_indices = @transform_3, window_bounds = array<i64: 1, 128>}, {transform_indices = @transform_4, window_bounds = array<i64: 128, 4>}, {pipeline_mode = #tpu.pipeline_mode<synchronous>, transform_indices = @transform_5, window_bounds = array<i64: 4, 128>}, {pipeline_mode = #tpu.pipeline_mode<synchronous>, transform_indices = @transform_6, window_bounds = array<i64: 1, 128>}, {pipeline_mode = #tpu.pipeline_mode<synchronous>, transform_indices = @transform_7, window_bounds = array<i64: 1, 128>}, {transform_indices = @transform_8, window_bounds = array<i64: 128, 128>}, {transform_indices = @transform_9, window_bounds = array<i64: 128, 128>}, {pipeline_mode = #tpu.pipeline_mode<synchronous>, transform_indices = @transform_10, window_bounds = array<i64: 1, 128>}, {pipeline_mode = #tpu.pipeline_mode<synchronous>, transform_indices = @transform_11, window_bounds = array<i64: 1, 128>}, {pipeline_mode = #tpu.pipeline_mode<synchronous>, transform_indices = @transform_12, window_bounds = array<i64: 1, 128>}, {pipeline_mode = #tpu.pipeline_mode<synchronous>, transform_indices = @transform_13, window_bounds = array<i64: 1, 128>}]} {
    %c0_i32 = arith.constant 0 : i32
    %0 = arith.cmpi eq, %arg0, %c0_i32 : i32
    %1 = arith.extui %0 : i1 to i32
    %c0_i32_0 = arith.constant 0 : i32
    %2 = arith.cmpi ne, %1, %c0_i32_0 : i32
    scf.if %2 {
      %cst_34 = arith.constant 0.000000e+00 : f32
      %36 = vector.broadcast %cst_34 : f32 to vector<1x128xf32>
      %c0_35 = arith.constant 0 : index
      %c0_36 = arith.constant 0 : index
      %37 = vector.load %arg15[%c0_35, %c0_36] : memref<1x128xf32, #tpu.memory_space<vmem>>, vector<1x128xf32>
      tpu.vector_store %arg15[%c0_35, %c0_36], %36 {strides = array<i32>} : memref<1x128xf32, #tpu.memory_space<vmem>>, vector<1x128xf32>,
      %cst_37 = arith.constant 0.000000e+00 : f32
      %38 = vector.broadcast %cst_37 : f32 to vector<1x128xf32>
      %c0_38 = arith.constant 0 : index
      %c0_39 = arith.constant 0 : index
      %39 = vector.load %arg16[%c0_38, %c0_39] : memref<1x128xf32, #tpu.memory_space<vmem>>, vector<1x128xf32>
      tpu.vector_store %arg16[%c0_38, %c0_39], %38 {strides = array<i32>} : memref<1x128xf32, #tpu.memory_space<vmem>>, vector<1x128xf32>,
      %cst_40 = arith.constant 0.000000e+00 : f32
      %40 = vector.broadcast %cst_40 : f32 to vector<1x128xf32>
      %c0_41 = arith.constant 0 : index
      %c0_42 = arith.constant 0 : index
      %41 = vector.load %arg17[%c0_41, %c0_42] : memref<1x128xf32, #tpu.memory_space<vmem>>, vector<1x128xf32>
      tpu.vector_store %arg17[%c0_41, %c0_42], %40 {strides = array<i32>} : memref<1x128xf32, #tpu.memory_space<vmem>>, vector<1x128xf32>,
      %cst_43 = arith.constant 0.000000e+00 : f32
      %42 = vector.broadcast %cst_43 : f32 to vector<1x128xf32>
      %c0_44 = arith.constant 0 : index
      %c0_45 = arith.constant 0 : index
      %43 = vector.load %arg18[%c0_44, %c0_45] : memref<1x128xf32, #tpu.memory_space<vmem>>, vector<1x128xf32>
      tpu.vector_store %arg18[%c0_44, %c0_45], %42 {strides = array<i32>} : memref<1x128xf32, #tpu.memory_space<vmem>>, vector<1x128xf32>,
    } else {
    }
    %c0 = arith.constant 0 : index
    %c0_1 = arith.constant 0 : index
    %3 = vector.load %arg1[%c0, %c0_1] : memref<128x72xf32, #tpu.memory_space<vmem>>, vector<128x72xf32>
    %c0_2 = arith.constant 0 : index
    %c0_3 = arith.constant 0 : index
    %4 = vector.load %arg2[%c0_2, %c0_3] : memref<72x128xf32, #tpu.memory_space<vmem>>, vector<72x128xf32>
    %cst = arith.constant dense<0.000000e+00> : vector<128x128xf32>
    %5 = tpu.matmul %3, %4, %cst {dimension_numbers = #tpu.dot_dimension_numbers<[1], [0], [0], [1], [0, 0, 1, 1], [], []>} : vector<128x72xf32>, vector<72x128xf32>, vector<128x128xf32> -> vector<128x128xf32>
    %c0_4 = arith.constant 0 : index
    %c0_5 = arith.constant 0 : index
    %6 = vector.load %arg5[%c0_4, %c0_5] : memref<128x4xf32, #tpu.memory_space<vmem>>, vector<128x4xf32>
    %c0_6 = arith.constant 0 : index
    %c0_7 = arith.constant 0 : index
    %7 = vector.load %arg6[%c0_6, %c0_7] : memref<4x128xf32, #tpu.memory_space<vmem>>, vector<4x128xf32>
    %cst_8 = arith.constant dense<0.000000e+00> : vector<128x128xf32>
    %8 = tpu.matmul %6, %7, %cst_8 {dimension_numbers = #tpu.dot_dimension_numbers<[1], [0], [0], [1], [0, 0, 1, 1], [], []>} : vector<128x4xf32>, vector<4x128xf32>, vector<128x128xf32> -> vector<128x128xf32>
    %c0_9 = arith.constant 0 : index
    %c0_10 = arith.constant 0 : index
    %9 = vector.load %arg9[%c0_9, %c0_10] : memref<128x128xf32, #tpu.memory_space<vmem>>, vector<128x128xf32>
    tpu.vector_store %arg9[%c0_9, %c0_10], %5 {strides = array<i32>} : memref<128x128xf32, #tpu.memory_space<vmem>>, vector<128x128xf32>,
    %c0_11 = arith.constant 0 : index
    %c0_12 = arith.constant 0 : index
    %10 = vector.load %arg10[%c0_11, %c0_12] : memref<128x128xf32, #tpu.memory_space<vmem>>, vector<128x128xf32>
    tpu.vector_store %arg10[%c0_11, %c0_12], %8 {strides = array<i32>} : memref<128x128xf32, #tpu.memory_space<vmem>>, vector<128x128xf32>,
    %c0_13 = arith.constant 0 : index
    %c0_14 = arith.constant 0 : index
    %11 = vector.load %arg15[%c0_13, %c0_14] : memref<1x128xf32, #tpu.memory_space<vmem>>, vector<1x128xf32>
    %cst_15 = arith.constant dense<0.000000e+00> : vector<128xf32>
    %12 = vector.multi_reduction <add>, %5, %cst_15 [0] : vector<128x128xf32> to vector<128xf32>
    %13 = vector.shape_cast %12 : vector<128xf32> to vector<1x128xf32>
    %14 = arith.addf %11, %13 : vector<1x128xf32>
    %c0_16 = arith.constant 0 : index
    %c0_17 = arith.constant 0 : index
    %15 = vector.load %arg15[%c0_16, %c0_17] : memref<1x128xf32, #tpu.memory_space<vmem>>, vector<1x128xf32>
    tpu.vector_store %arg15[%c0_16, %c0_17], %14 {strides = array<i32>} : memref<1x128xf32, #tpu.memory_space<vmem>>, vector<1x128xf32>,
    %c0_18 = arith.constant 0 : index
    %c0_19 = arith.constant 0 : index
    %16 = vector.load %arg16[%c0_18, %c0_19] : memref<1x128xf32, #tpu.memory_space<vmem>>, vector<1x128xf32>
    %17 = arith.mulf %5, %5 : vector<128x128xf32>
    %cst_20 = arith.constant dense<0.000000e+00> : vector<128xf32>
    %18 = vector.multi_reduction <add>, %17, %cst_20 [0] : vector<128x128xf32> to vector<128xf32>
    %19 = vector.shape_cast %18 : vector<128xf32> to vector<1x128xf32>
    %20 = arith.addf %16, %19 : vector<1x128xf32>
    %c0_21 = arith.constant 0 : index
    %c0_22 = arith.constant 0 : index
    %21 = vector.load %arg16[%c0_21, %c0_22] : memref<1x128xf32, #tpu.memory_space<vmem>>, vector<1x128xf32>
    tpu.vector_store %arg16[%c0_21, %c0_22], %20 {strides = array<i32>} : memref<1x128xf32, #tpu.memory_space<vmem>>, vector<1x128xf32>,
    %c0_23 = arith.constant 0 : index
    %c0_24 = arith.constant 0 : index
    %22 = vector.load %arg17[%c0_23, %c0_24] : memref<1x128xf32, #tpu.memory_space<vmem>>, vector<1x128xf32>
    %cst_25 = arith.constant dense<0.000000e+00> : vector<128xf32>
    %23 = vector.multi_reduction <add>, %8, %cst_25 [0] : vector<128x128xf32> to vector<128xf32>
    %24 = vector.shape_cast %23 : vector<128xf32> to vector<1x128xf32>
    %25 = arith.addf %22, %24 : vector<1x128xf32>
    %c0_26 = arith.constant 0 : index
    %c0_27 = arith.constant 0 : index
    %26 = vector.load %arg17[%c0_26, %c0_27] : memref<1x128xf32, #tpu.memory_space<vmem>>, vector<1x128xf32>
    tpu.vector_store %arg17[%c0_26, %c0_27], %25 {strides = array<i32>} : memref<1x128xf32, #tpu.memory_space<vmem>>, vector<1x128xf32>,
    %c0_28 = arith.constant 0 : index
    %c0_29 = arith.constant 0 : index
    %27 = vector.load %arg18[%c0_28, %c0_29] : memref<1x128xf32, #tpu.memory_space<vmem>>, vector<1x128xf32>
    %28 = arith.mulf %8, %8 : vector<128x128xf32>
    %cst_30 = arith.constant dense<0.000000e+00> : vector<128xf32>
    %29 = vector.multi_reduction <add>, %28, %cst_30 [0] : vector<128x128xf32> to vector<128xf32>
    %30 = vector.shape_cast %29 : vector<128xf32> to vector<1x128xf32>
    %31 = arith.addf %27, %30 : vector<1x128xf32>
    %c0_31 = arith.constant 0 : index
    %c0_32 = arith.constant 0 : index
    %32 = vector.load %arg18[%c0_31, %c0_32] : memref<1x128xf32, #tpu.memory_space<vmem>>, vector<1x128xf32>
    tpu.vector_store %arg18[%c0_31, %c0_32], %31 {strides = array<i32>} : memref<1x128xf32, #tpu.memory_space<vmem>>, vector<1x128xf32>,
    %c3_i32 = arith.constant 3 : i32
    %33 = arith.cmpi eq, %arg0, %c3_i32 : i32
    %34 = arith.extui %33 : i1 to i32
    %c0_i32_33 = arith.constant 0 : i32
    %35 = arith.cmpi ne, %34, %c0_i32_33 : i32
    scf.if %35 {
      %c0_34 = arith.constant 0 : index
      %c0_35 = arith.constant 0 : index
      %36 = vector.load %arg15[%c0_34, %c0_35] : memref<1x128xf32, #tpu.memory_space<vmem>>, vector<1x128xf32>
      %cst_36 = arith.constant 0.001953125 : f32
      %37 = vector.broadcast %cst_36 : f32 to vector<1x128xf32>
      %38 = arith.mulf %36, %37 : vector<1x128xf32>
      %c0_37 = arith.constant 0 : index
      %c0_38 = arith.constant 0 : index
      %39 = vector.load %arg16[%c0_37, %c0_38] : memref<1x128xf32, #tpu.memory_space<vmem>>, vector<1x128xf32>
      %cst_39 = arith.constant 0.001953125 : f32
      %40 = vector.broadcast %cst_39 : f32 to vector<1x128xf32>
      %41 = arith.mulf %39, %40 : vector<1x128xf32>
      %42 = arith.mulf %38, %38 : vector<1x128xf32>
      %43 = arith.subf %41, %42 : vector<1x128xf32>
      %cst_40 = arith.constant 0.000000e+00 : f32
      %44 = vector.broadcast %cst_40 : f32 to vector<1x128xf32>
      %45 = arith.maximumf %43, %44 : vector<1x128xf32>
      %c0_41 = arith.constant 0 : index
      %c0_42 = arith.constant 0 : index
      %46 = vector.load %arg3[%c0_41, %c0_42] : memref<1x128xf32, #tpu.memory_space<vmem>>, vector<1x128xf32>
      %cst_43 = arith.constant 9.99999974E-6 : f32
      %47 = vector.broadcast %cst_43 : f32 to vector<1x128xf32>
      %48 = arith.addf %45, %47 : vector<1x128xf32>
      %49 = math.rsqrt %48 : vector<1x128xf32>
      %50 = arith.mulf %46, %49 : vector<1x128xf32>
      %c0_44 = arith.constant 0 : index
      %c0_45 = arith.constant 0 : index
      %51 = vector.load %arg11[%c0_44, %c0_45] : memref<1x128xf32, #tpu.memory_space<vmem>>, vector<1x128xf32>
      tpu.vector_store %arg11[%c0_44, %c0_45], %50 {strides = array<i32>} : memref<1x128xf32, #tpu.memory_space<vmem>>, vector<1x128xf32>,
      %c0_46 = arith.constant 0 : index
      %c0_47 = arith.constant 0 : index
      %52 = vector.load %arg4[%c0_46, %c0_47] : memref<1x128xf32, #tpu.memory_space<vmem>>, vector<1x128xf32>
      %53 = arith.mulf %38, %50 : vector<1x128xf32>
      %54 = arith.subf %52, %53 : vector<1x128xf32>
      %c0_48 = arith.constant 0 : index
      %c0_49 = arith.constant 0 : index
      %55 = vector.load %arg12[%c0_48, %c0_49] : memref<1x128xf32, #tpu.memory_space<vmem>>, vector<1x128xf32>
      tpu.vector_store %arg12[%c0_48, %c0_49], %54 {strides = array<i32>} : memref<1x128xf32, #tpu.memory_space<vmem>>, vector<1x128xf32>,
      %c0_50 = arith.constant 0 : index
      %c0_51 = arith.constant 0 : index
      %56 = vector.load %arg17[%c0_50, %c0_51] : memref<1x128xf32, #tpu.memory_space<vmem>>, vector<1x128xf32>
      %cst_52 = arith.constant 0.001953125 : f32
      %57 = vector.broadcast %cst_52 : f32 to vector<1x128xf32>
      %58 = arith.mulf %56, %57 : vector<1x128xf32>
      %c0_53 = arith.constant 0 : index
      %c0_54 = arith.constant 0 : index
      %59 = vector.load %arg18[%c0_53, %c0_54] : memref<1x128xf32, #tpu.memory_space<vmem>>, vector<1x128xf32>
      %cst_55 = arith.constant 0.001953125 : f32
      %60 = vector.broadcast %cst_55 : f32 to vector<1x128xf32>
      %61 = arith.mulf %59, %60 : vector<1x128xf32>
      %62 = arith.mulf %58, %58 : vector<1x128xf32>
      %63 = arith.subf %61, %62 : vector<1x128xf32>
      %cst_56 = arith.constant 0.000000e+00 : f32
      %64 = vector.broadcast %cst_56 : f32 to vector<1x128xf32>
      %65 = arith.maximumf %63, %64 : vector<1x128xf32>
      %c0_57 = arith.constant 0 : index
      %c0_58 = arith.constant 0 : index
      %66 = vector.load %arg7[%c0_57, %c0_58] : memref<1x128xf32, #tpu.memory_space<vmem>>, vector<1x128xf32>
      %cst_59 = arith.constant 9.99999974E-6 : f32
      %67 = vector.broadcast %cst_59 : f32 to vector<1x128xf32>
      %68 = arith.addf %65, %67 : vector<1x128xf32>
      %69 = math.rsqrt %68 : vector<1x128xf32>
      %70 = arith.mulf %66, %69 : vector<1x128xf32>
      %c0_60 = arith.constant 0 : index
      %c0_61 = arith.constant 0 : index
      %71 = vector.load %arg13[%c0_60, %c0_61] : memref<1x128xf32, #tpu.memory_space<vmem>>, vector<1x128xf32>
      tpu.vector_store %arg13[%c0_60, %c0_61], %70 {strides = array<i32>} : memref<1x128xf32, #tpu.memory_space<vmem>>, vector<1x128xf32>,
      %c0_62 = arith.constant 0 : index
      %c0_63 = arith.constant 0 : index
      %72 = vector.load %arg8[%c0_62, %c0_63] : memref<1x128xf32, #tpu.memory_space<vmem>>, vector<1x128xf32>
      %73 = arith.mulf %58, %70 : vector<1x128xf32>
      %74 = arith.subf %72, %73 : vector<1x128xf32>
      %c0_64 = arith.constant 0 : index
      %c0_65 = arith.constant 0 : index
      %75 = vector.load %arg14[%c0_64, %c0_65] : memref<1x128xf32, #tpu.memory_space<vmem>>, vector<1x128xf32>
      tpu.vector_store %arg14[%c0_64, %c0_65], %74 {strides = array<i32>} : memref<1x128xf32, #tpu.memory_space<vmem>>, vector<1x128xf32>,
    } else {
    }
    return
  }
  func.func @transform_0(%arg0: i32) -> (i32, i32) {
    %c0_i32 = arith.constant 0 : i32
    %c0_i32_0 = arith.constant 0 : i32
    return %arg0, %c0_i32 : i32, i32
  }
  func.func @transform_1(%arg0: i32) -> (i32, i32) {
    %c0_i32 = arith.constant 0 : i32
    %c0_i32_0 = arith.constant 0 : i32
    %c0_i32_1 = arith.constant 0 : i32
    return %c0_i32, %c0_i32_0 : i32, i32
  }
  func.func @transform_2(%arg0: i32) -> (i32, i32) {
    %c0_i32 = arith.constant 0 : i32
    %c0_i32_0 = arith.constant 0 : i32
    %c0_i32_1 = arith.constant 0 : i32
    return %c0_i32, %c0_i32_0 : i32, i32
  }
  func.func @transform_3(%arg0: i32) -> (i32, i32) {
    %c0_i32 = arith.constant 0 : i32
    %c0_i32_0 = arith.constant 0 : i32
    %c0_i32_1 = arith.constant 0 : i32
    return %c0_i32, %c0_i32_0 : i32, i32
  }
  func.func @transform_4(%arg0: i32) -> (i32, i32) {
    %c0_i32 = arith.constant 0 : i32
    %c0_i32_0 = arith.constant 0 : i32
    return %arg0, %c0_i32 : i32, i32
  }
  func.func @transform_5(%arg0: i32) -> (i32, i32) {
    %c0_i32 = arith.constant 0 : i32
    %c0_i32_0 = arith.constant 0 : i32
    %c0_i32_1 = arith.constant 0 : i32
    return %c0_i32, %c0_i32_0 : i32, i32
  }
  func.func @transform_6(%arg0: i32) -> (i32, i32) {
    %c0_i32 = arith.constant 0 : i32
    %c0_i32_0 = arith.constant 0 : i32
    %c0_i32_1 = arith.constant 0 : i32
    return %c0_i32, %c0_i32_0 : i32, i32
  }
  func.func @transform_7(%arg0: i32) -> (i32, i32) {
    %c0_i32 = arith.constant 0 : i32
    %c0_i32_0 = arith.constant 0 : i32
    %c0_i32_1 = arith.constant 0 : i32
    return %c0_i32, %c0_i32_0 : i32, i32
  }
  func.func @transform_8(%arg0: i32) -> (i32, i32) {
    %c0_i32 = arith.constant 0 : i32
    %c0_i32_0 = arith.constant 0 : i32
    return %arg0, %c0_i32 : i32, i32
  }
  func.func @transform_9(%arg0: i32) -> (i32, i32) {
    %c0_i32 = arith.constant 0 : i32
    %c0_i32_0 = arith.constant 0 : i32
    return %arg0, %c0_i32 : i32, i32
  }
  func.func @transform_10(%arg0: i32) -> (i32, i32) {
    %c0_i32 = arith.constant 0 : i32
    %c0_i32_0 = arith.constant 0 : i32
    %c0_i32_1 = arith.constant 0 : i32
    return %c0_i32, %c0_i32_0 : i32, i32
  }
  func.func @transform_11(%arg0: i32) -> (i32, i32) {
    %c0_i32 = arith.constant 0 : i32
    %c0_i32_0 = arith.constant 0 : i32
    %c0_i32_1 = arith.constant 0 : i32
    return %c0_i32, %c0_i32_0 : i32, i32
  }
  func.func @transform_12(%arg0: i32) -> (i32, i32) {
    %c0_i32 = arith.constant 0 : i32
    %c0_i32_0 = arith.constant 0 : i32
    %c0_i32_1 = arith.constant 0 : i32
    return %c0_i32, %c0_i32_0 : i32, i32
  }
  func.func @transform_13(%arg0: i32) -> (i32, i32) {
    %c0_i32 = arith.constant 0 : i32
    %c0_i32_0 = arith.constant 0 : i32
    %c0_i32_1 = arith.constant 0 : i32
    return %c0_i32, %c0_i32_0 : i32, i32
  }
}

module attributes {stable_mosaic.version = 11 : i64} {
  func.func @_dual_bn_add_relu_kernel(%arg0: i32, %arg1: memref<128x128xf32, #tpu.memory_space<vmem>>, %arg2: memref<128x128xf32, #tpu.memory_space<vmem>>, %arg3: memref<1x128xf32, #tpu.memory_space<vmem>>, %arg4: memref<1x128xf32, #tpu.memory_space<vmem>>, %arg5: memref<1x128xf32, #tpu.memory_space<vmem>>, %arg6: memref<1x128xf32, #tpu.memory_space<vmem>>, %arg7: memref<128x128xf32, #tpu.memory_space<vmem>>) attributes {dimension_semantics = [#tpu.dimension_semantics<parallel>], iteration_bounds = array<i64: 4>, scalar_prefetch = 0 : i64, scratch_operands = 0 : i64, tpu.core_type = #tpu.core_type<tc>, window_params = [{transform_indices = @transform_0, window_bounds = array<i64: 128, 128>}, {transform_indices = @transform_1, window_bounds = array<i64: 128, 128>}, {pipeline_mode = #tpu.pipeline_mode<synchronous>, transform_indices = @transform_2, window_bounds = array<i64: 1, 128>}, {pipeline_mode = #tpu.pipeline_mode<synchronous>, transform_indices = @transform_3, window_bounds = array<i64: 1, 128>}, {pipeline_mode = #tpu.pipeline_mode<synchronous>, transform_indices = @transform_4, window_bounds = array<i64: 1, 128>}, {pipeline_mode = #tpu.pipeline_mode<synchronous>, transform_indices = @transform_5, window_bounds = array<i64: 1, 128>}, {transform_indices = @transform_6, window_bounds = array<i64: 128, 128>}]} {
    %c0 = arith.constant 0 : index
    %c0_0 = arith.constant 0 : index
    %0 = vector.load %arg1[%c0, %c0_0] : memref<128x128xf32, #tpu.memory_space<vmem>>, vector<128x128xf32>
    %c0_1 = arith.constant 0 : index
    %c0_2 = arith.constant 0 : index
    %1 = vector.load %arg3[%c0_1, %c0_2] : memref<1x128xf32, #tpu.memory_space<vmem>>, vector<1x128xf32>
    %2 = vector.broadcast %1 : vector<1x128xf32> to vector<128x128xf32>
    %3 = arith.mulf %0, %2 : vector<128x128xf32>
    %c0_3 = arith.constant 0 : index
    %c0_4 = arith.constant 0 : index
    %4 = vector.load %arg4[%c0_3, %c0_4] : memref<1x128xf32, #tpu.memory_space<vmem>>, vector<1x128xf32>
    %5 = vector.broadcast %4 : vector<1x128xf32> to vector<128x128xf32>
    %6 = arith.addf %3, %5 : vector<128x128xf32>
    %c0_5 = arith.constant 0 : index
    %c0_6 = arith.constant 0 : index
    %7 = vector.load %arg2[%c0_5, %c0_6] : memref<128x128xf32, #tpu.memory_space<vmem>>, vector<128x128xf32>
    %c0_7 = arith.constant 0 : index
    %c0_8 = arith.constant 0 : index
    %8 = vector.load %arg5[%c0_7, %c0_8] : memref<1x128xf32, #tpu.memory_space<vmem>>, vector<1x128xf32>
    %9 = vector.broadcast %8 : vector<1x128xf32> to vector<128x128xf32>
    %10 = arith.mulf %7, %9 : vector<128x128xf32>
    %c0_9 = arith.constant 0 : index
    %c0_10 = arith.constant 0 : index
    %11 = vector.load %arg6[%c0_9, %c0_10] : memref<1x128xf32, #tpu.memory_space<vmem>>, vector<1x128xf32>
    %12 = vector.broadcast %11 : vector<1x128xf32> to vector<128x128xf32>
    %13 = arith.addf %10, %12 : vector<128x128xf32>
    %14 = arith.addf %6, %13 : vector<128x128xf32>
    %cst = arith.constant 0.000000e+00 : f32
    %15 = vector.broadcast %cst : f32 to vector<128x128xf32>
    %16 = arith.maximumf %14, %15 : vector<128x128xf32>
    %c0_11 = arith.constant 0 : index
    %c0_12 = arith.constant 0 : index
    %17 = vector.load %arg7[%c0_11, %c0_12] : memref<128x128xf32, #tpu.memory_space<vmem>>, vector<128x128xf32>
    tpu.vector_store %arg7[%c0_11, %c0_12], %16 {strides = array<i32>} : memref<128x128xf32, #tpu.memory_space<vmem>>, vector<128x128xf32>,
    return
  }
  func.func @transform_0(%arg0: i32) -> (i32, i32) {
    %c0_i32 = arith.constant 0 : i32
    %c0_i32_0 = arith.constant 0 : i32
    return %arg0, %c0_i32 : i32, i32
  }
  func.func @transform_1(%arg0: i32) -> (i32, i32) {
    %c0_i32 = arith.constant 0 : i32
    %c0_i32_0 = arith.constant 0 : i32
    return %arg0, %c0_i32 : i32, i32
  }
  func.func @transform_2(%arg0: i32) -> (i32, i32) {
    %c0_i32 = arith.constant 0 : i32
    %c0_i32_0 = arith.constant 0 : i32
    %c0_i32_1 = arith.constant 0 : i32
    return %c0_i32, %c0_i32_0 : i32, i32
  }
  func.func @transform_3(%arg0: i32) -> (i32, i32) {
    %c0_i32 = arith.constant 0 : i32
    %c0_i32_0 = arith.constant 0 : i32
    %c0_i32_1 = arith.constant 0 : i32
    return %c0_i32, %c0_i32_0 : i32, i32
  }
  func.func @transform_4(%arg0: i32) -> (i32, i32) {
    %c0_i32 = arith.constant 0 : i32
    %c0_i32_0 = arith.constant 0 : i32
    %c0_i32_1 = arith.constant 0 : i32
    return %c0_i32, %c0_i32_0 : i32, i32
  }
  func.func @transform_5(%arg0: i32) -> (i32, i32) {
    %c0_i32 = arith.constant 0 : i32
    %c0_i32_0 = arith.constant 0 : i32
    %c0_i32_1 = arith.constant 0 : i32
    return %c0_i32, %c0_i32_0 : i32, i32
  }
  func.func @transform_6(%arg0: i32) -> (i32, i32) {
    %c0_i32 = arith.constant 0 : i32
    %c0_i32_0 = arith.constant 0 : i32
    return %arg0, %c0_i32 : i32, i32
  }
}

</mosaic_0001>

<bundles_post_ra>
// kernel: _lambda_.5
= control target key start
LH: loop header
LB: loop body
LE: loop exit
PB: predicated region body
PF: predicated region fallthrough
CT: control target
= control target key end

     0   :  { %s367_s12 = smov 0   ;;  %s444_s0 = inlined_call_operand.vmem [shape: f32[512,128], index: 0, kind: input, shape index: {}]   ;;  %s445_s1 = inlined_call_operand.vmem [shape: f32[1,128], index: 1, kind: input, shape index: {}]   ;;  %s446_s2 = inlined_call_operand.vmem [shape: f32[1,128], index: 2, kind: input, shape index: {}]   ;;  %s447_s3 = inlined_call_operand.vmem [shape: f32[512,128], index: 3, kind: output, shape index: {}]  }
   0x1 LB: > { %s318_s13 = sadd.s32 4294967295, %s345_s12   ;;  %p322_p0 = scmp.ge.s32.totalorder %s345_s12, 1  ;;  %s345_s12 = sphi %s367_s12, %s13_s12  }
   0x2   : > { %p138_p1 = scmp.lt.s32.totalorder %s345_s12, 5 }
   0x4   : > { %p139_p2 = pnand %p322_p0, %p138_p1 }
   0x5   : > { %s323_s14 = sshll.u32 (!%p139_p2), %s318_s13, 4 }
   0x6   : > { %142 = sbr.rel (%p139_p2) target bundleno = 37 (0x25), region = 32  ;;  %p163_p3 = scmp.lt.s32.totalorder (!%p139_p2), %s323_s14, 63 }
   0xb   : > { %s449_s14 = smov (!%p163_p3, %s323_s14), 63  ;;  %v337_v0 = vld [vmem:[%s445_s1] ss:$0 sm:$0xff] }
   0xc   : > { %s324_s17 = sshll.u32 %s449_s14, 3  ;;  %v386_v1 = vld [vmem:[%s446_s2] ss:$0 sm:$0xff] }
   0xd   : > { %s381_s20 = scalar_lea.vmem %s444_s0, %s324_s17  ;;  %s402_s25 = scalar_lea.vmem %s447_s3, %s324_s17 }
   0xe   : > { %v174_v2 = vld [vmem:[%s381_s20] sm:$0xff]  ;;  %v175_v3 = vld [vmem:[%s381_s20 + $0x8] sm:$0xff]  ;;  %v176_v4 = vld [vmem:[%s381_s20 + $0x10] sm:$0xff] }
   0xf   : > { %v194_v5 = vmul.f32 %v337_v0, %v174_v2  ;;  %v195_v6 = vmul.f32 %v337_v0, %v175_v3  ;;  %v196_v7 = vmul.f32 %v337_v0, %v176_v4  ;;  %v177_v8 = vld [vmem:[%s381_s20 + $0x18] sm:$0xff]  ;;  %v178_v9 = vld [vmem:[%s381_s20 + $0x20] sm:$0xff]  ;;  %v179_v10 = vld [vmem:[%s381_s20 + $0x28] sm:$0xff] }
  0x10   : > { %v197_v11 = vmul.f32 %v337_v0, %v177_v8  ;;  %v198_v12 = vmul.f32 %v337_v0, %v178_v9  ;;  %v199_v13 = vmul.f32 %v337_v0, %v179_v10  ;;  %v180_v14 = vld [vmem:[%s381_s20 + $0x30] sm:$0xff]  ;;  %v181_v15 = vld [vmem:[%s381_s20 + $0x38] sm:$0xff]  ;;  %v182_v24 = vld [vmem:[%s381_s20 + $0x40] sm:$0xff] }
  0x11   : > { %v214_v16 = vadd.f32 %v386_v1, %v194_v5  ;;  %v215_v17 = vadd.f32 %v386_v1, %v195_v6  ;;  %v216_v18 = vadd.f32 %v386_v1, %v196_v7  ;;  %v200_v19 = vmul.f32 %v337_v0, %v180_v14  ;;  %v183_v25 = vld [vmem:[%s381_s20 + $0x48] sm:$0xff]  ;;  %v184_v26 = vld [vmem:[%s381_s20 + $0x50] sm:$0xff]  ;;  %v185_v31 = vld [vmem:[%s381_s20 + $0x58] sm:$0xff] }
  0x12   : > { %v217_v20 = vadd.f32 %v386_v1, %v197_v11  ;;  %v218_v21 = vadd.f32 %v386_v1, %v198_v12  ;;  %v219_v22 = vadd.f32 %v386_v1, %v199_v13  ;;  %v201_v23 = vmul.f32 %v337_v0, %v181_v15  ;;  %v186_v32 = vld [vmem:[%s381_s20 + $0x60] sm:$0xff]  ;;  %v187_v33 = vld [vmem:[%s381_s20 + $0x68] sm:$0xff]  ;;  %v188_v37 = vld [vmem:[%s381_s20 + $0x70] sm:$0xff] }
  0x13   : > { %v230_v27 = vmax.f32 %v214_v16, 0.0  ;;  %v231_v28 = vmax.f32 %v215_v17, 0.0  ;;  %v232_v29 = vmax.f32 %v216_v18, 0.0  ;;  %v220_v30 = vadd.f32 %v386_v1, %v200_v19  ;;  %v189_v42 = vld [vmem:[%s381_s20 + $0x78] sm:$0xff] }
  0x14   : > { %v233_v34 = vmax.f32 %v217_v20, 0.0  ;;  %v234_v35 = vmax.f32 %v218_v21, 0.0  ;;  %v221_v36 = vadd.f32 %v386_v1, %v201_v23  ;;  %v235_v38 = vmax.f32 %v219_v22, 0.0 }
  0x15   : > { %246 = vst [vmem:[%s402_s25] sm:$0xff] %v230_v27  ;;  %v202_v39 = vmul.f32 %v337_v0, %v182_v24  ;;  %v203_v40 = vmul.f32 %v337_v0, %v183_v25  ;;  %v204_v41 = vmul.f32 %v337_v0, %v184_v26  ;;  %v236_v43 = vmax.f32 %v220_v30, 0.0 }
  0x16   : > { %247 = vst [vmem:[%s402_s25 + $0x8] sm:$0xff] %v231_v28  ;;  %v205_v44 = vmul.f32 %v337_v0, %v185_v31  ;;  %v206_v45 = vmul.f32 %v337_v0, %v186_v32  ;;  %v207_v46 = vmul.f32 %v337_v0, %v187_v33  ;;  %v208_v50 = vmul.f32 %v337_v0, %v188_v37 }
  0x17   : > { %248 = vst [vmem:[%s402_s25 + $0x10] sm:$0xff] %v232_v29  ;;  %v222_v47 = vadd.f32 %v386_v1, %v202_v39  ;;  %v223_v48 = vadd.f32 %v386_v1, %v203_v40  ;;  %v224_v49 = vadd.f32 %v386_v1, %v204_v41  ;;  %v237_v51 = vmax.f32 %v221_v36, 0.0 }
  0x18   : > { %249 = vst [vmem:[%s402_s25 + $0x18] sm:$0xff] %v233_v34  ;;  %v225_v52 = vadd.f32 %v386_v1, %v205_v44  ;;  %v209_v53 = vmul.f32 %v337_v0, %v189_v42  ;;  %v226_v55 = vadd.f32 %v386_v1, %v206_v45  ;;  %v227_v57 = vadd.f32 %v386_v1, %v207_v46 }
  0x19   : > { %250 = vst [vmem:[%s402_s25 + $0x20] sm:$0xff] %v234_v35  ;;  %v238_v54 = vmax.f32 %v222_v47, 0.0  ;;  %v239_v56 = vmax.f32 %v223_v48, 0.0  ;;  %v240_v58 = vmax.f32 %v224_v49, 0.0  ;;  %v228_v59 = vadd.f32 %v386_v1, %v208_v50 }
  0x1a   : > { %251 = vst [vmem:[%s402_s25 + $0x28] sm:$0xff] %v235_v38  ;;  %v241_v60 = vmax.f32 %v225_v52, 0.0  ;;  %v229_v61 = vadd.f32 %v386_v1, %v209_v53  ;;  %v242_v62 = vmax.f32 %v226_v55, 0.0  ;;  %v243_v63 = vmax.f32 %v227_v57, 0.0 }
  0x1b   : > { %252 = vst [vmem:[%s402_s25 + $0x30] sm:$0xff] %v236_v43  ;;  %v244_v0 = vmax.f32 %v228_v59, 0.0 }
  0x1c   : > { %253 = vst [vmem:[%s402_s25 + $0x38] sm:$0xff] %v237_v51  ;;  %v245_v2 = vmax.f32 %v229_v61, 0.0 }
  0x1d   : > { %254 = vst [vmem:[%s402_s25 + $0x40] sm:$0xff] %v238_v54 }
  0x1e   : > { %255 = vst [vmem:[%s402_s25 + $0x48] sm:$0xff] %v239_v56 }
  0x1f   : > { %256 = vst [vmem:[%s402_s25 + $0x50] sm:$0xff] %v240_v58 }
  0x20   : > { %257 = vst [vmem:[%s402_s25 + $0x58] sm:$0xff] %v241_v60 }
  0x21   : > { %258 = vst [vmem:[%s402_s25 + $0x60] sm:$0xff] %v242_v62 }
  0x22   : > { %259 = vst [vmem:[%s402_s25 + $0x68] sm:$0xff] %v243_v63 }
  0x23   : > { %260 = vst [vmem:[%s402_s25 + $0x70] sm:$0xff] %v244_v0 }
  0x24   : > { %261 = vst [vmem:[%s402_s25 + $0x78] sm:$0xff] %v245_v2 }
  0x25 PF: > { %s13_s12 = sadd.s32 1, %s345_s12  }
  0x26   : > { %p10_p4 = scmp.ge.s32.totalorder %s13_s12, 6  }
  0x28   :  { %12 = sbr.rel (!%p10_p4) target bundleno = 1 (0x1), region = 62 }

// kernel: _lambda_.4
= control target key start
LH: loop header
LB: loop body
LE: loop exit
PB: predicated region body
PF: predicated region fallthrough
CT: control target
= control target key end

     0   :  { %s672_s21 = smov 0   ;;  %s773_s0 = inlined_call_operand.vmem [shape: f32[512,36], index: 0, kind: input, shape index: {}]   ;;  %s774_s1 = inlined_call_operand.vmem [shape: f32[36,128], index: 1, kind: input, shape index: {}]   ;;  %s775_s2 = inlined_call_operand.vmem [shape: f32[1,128], index: 2, kind: input, shape index: {}]   ;;  %s776_s3 = inlined_call_operand.vmem [shape: f32[1,128], index: 3, kind: input, shape index: {}]   ;;  %s777_s4 = inlined_call_operand.vmem [shape: f32[512,128], index: 4, kind: output, shape index: {0}]   ;;  %s778_s5 = inlined_call_operand.vmem [shape: f32[1,128], index: 5, kind: output, shape index: {1}]   ;;  %s779_s6 = inlined_call_operand.vmem [shape: f32[1,128], index: 6, kind: output, shape index: {2}]  }
   0x1 LB: > { %s678_s22 = sadd.s32 4294967295, %s634_s21   ;;  %p576_p0 = scmp.ge.s32.totalorder %s634_s21, 1  ;;  %s634_s21 = sphi %s672_s21, %s17_s21  }
   0x2   : > { %p208_p1 = scmp.lt.s32.totalorder %s634_s21, 5 }
   0x4   : > { %p209_p2 = pnand %p576_p0, %p208_p1 }
   0x5   : > { %s577_s23 = sshll.u32 (!%p209_p2), %s678_s22, 4  ;;  %p581_p4 = scmp.ne.s32.totalorder (!%p209_p2), %s678_s22, 0 }
   0x6   : > { %212 = sbr.rel (%p209_p2) target bundleno = 262 (0x106), region = 36  ;;  %p239_p3 = scmp.lt.s32.totalorder (!%p209_p2), %s577_s23, 63 }
   0xb   : > { %s781_s23 = smov (!%p239_p3, %s577_s23), 63  ;;  %253 = sbr.rel (%p581_p4) target bundleno = 19 (0x13), region = 40 }
   0xc   : > { %s578_s24 = sshll.u32 %s781_s23, 3 }
   0xd   : > { %s686_s27 = scalar_lea.vmem %s773_s0, %s578_s24  ;;  %s691_s30 = scalar_lea.vmem %s777_s4, %s578_s24 }
  0x10   : > { %v636_v0 = vmov 0.0  }
  0x11   : > { %254 = vst [vmem:[#allocation2] sm:$0x1] %v636_v0 }
  0x12   : > { %255 = vst [vmem:[#allocation3] sm:$0x1] %v636_v0 }
  0x13 PF: > { %v276_v1 = vld [vmem:[%s774_s1 + $0x20] sm:$0xf]  ;;  %vm326_vm0 = vcmask 1043456   ;;  %v275_v2 = vld [vmem:[%s774_s1 + $0x18] sm:$0xff]  ;;  %v274_v3 = vld [vmem:[%s774_s1 + $0x10] sm:$0xff]  ;;  %vm277_vm1 = vcmask 293888  }
  0x14   : > { %582 = vmatpush.msk.msra.mxu0 %vm326_vm0, %v276_v1  ;;  %602 = vmatpush.msk.msra.mxu1 %vm326_vm0, %v276_v1  ;;  %v273_v4 = vld [vmem:[%s774_s1 + $0x8] sm:$0xff]  ;;  %v272_v5 = vld [vmem:[%s774_s1] sm:$0xff]  ;;  %v258_v14 = vld [vmem:[%s686_s27 + $0x10] sm:$0xff]  ;;  %p599_p5 = scmp.ne.s32.totalorder %s678_s22, 3 }
  0x15   : > { %603 = vmatpush.msk.msra.mxu2 %vm326_vm0, %v276_v1  ;;  %604 = vmatpush.msk.msra.mxu3 %vm326_vm0, %v276_v1  ;;  %v256_v6 = vld [vmem:[%s686_s27] sm:$0xff]  ;;  %v257_v10 = vld [vmem:[%s686_s27 + $0x8] sm:$0xff]  ;;  %v262_v15 = vld [vmem:[%s686_s27 + $0x30] sm:$0xff] }
  0x16   : > { %342 = vmatpush.msra.mxu0 %v275_v2  ;;  %605 = vmatpush.msra.mxu1 %v275_v2  ;;  %v260_v7 = vld [vmem:[%s686_s27 + $0x20] sm:$0xff]  ;;  %v261_v11 = vld [vmem:[%s686_s27 + $0x28] sm:$0xff]  ;;  %v266_v16 = vld [vmem:[%s686_s27 + $0x50] sm:$0xff] }
  0x17   : > { %606 = vmatpush.msra.mxu2 %v275_v2  ;;  %607 = vmatpush.msra.mxu3 %v275_v2  ;;  %v264_v8 = vld [vmem:[%s686_s27 + $0x40] sm:$0xff]  ;;  %v265_v12 = vld [vmem:[%s686_s27 + $0x48] sm:$0xff]  ;;  %v270_v17 = vld [vmem:[%s686_s27 + $0x70] sm:$0xff] }
  0x18   : > { %343 = vmatpush.msra.mxu0 %v274_v3  ;;  %608 = vmatpush.msra.mxu1 %v274_v3  ;;  %v268_v9 = vld [vmem:[%s686_s27 + $0x60] sm:$0xff]  ;;  %v269_v13 = vld [vmem:[%s686_s27 + $0x68] sm:$0xff]  ;;  %v259_v18 = vld [vmem:[%s686_s27 + $0x18] sm:$0xff] }
  0x19   : > { %609 = vmatpush.msra.mxu2 %v274_v3  ;;  %610 = vmatpush.msra.mxu3 %v274_v3  ;;  %v263_v19 = vld [vmem:[%s686_s27 + $0x38] sm:$0xff] }
  0x1a   : > { %344 = vmatpush.msra.mxu0 %v273_v4  ;;  %611 = vmatpush.msra.mxu1 %v273_v4  ;;  %v267_v20 = vld [vmem:[%s686_s27 + $0x58] sm:$0xff] }
  0x1b   : > { %612 = vmatpush.msra.mxu2 %v273_v4  ;;  %613 = vmatpush.msra.mxu3 %v273_v4  ;;  %v271_v21 = vld [vmem:[%s686_s27 + $0x78] sm:$0xff] }
  0x1c   : > { %345 = vmatpush.msra.mxu0 %v272_v5  ;;  %614 = vmatpush.msra.mxu1 %v272_v5 }
  0x1d   : > { %583 = vmatmul.msk.f32.vlgmr.msra.gmra.mxu0 %vm277_vm1, %v256_v6  ;;  %587 = vmatmul.msk.f32.vlgmr.msra.gmra.mxu1 %vm277_vm1, %v260_v7 }
  0x1e   : > { %615 = vmatpush.msra.mxu2 %v272_v5  ;;  %616 = vmatpush.msra.mxu3 %v272_v5 }
  0x1f   : > { %591 = vmatmul.msk.f32.vlgmr.msra.gmra.mxu2 %vm277_vm1, %v264_v8  ;;  %595 = vmatmul.msk.f32.vlgmr.msra.gmra.mxu3 %vm277_vm1, %v268_v9 }
  0x25   : > { %584 = vmatmul.msk.f32.gmra.mxu0 %vm277_vm1, %v257_v10  ;;  %588 = vmatmul.msk.f32.gmra.mxu1 %vm277_vm1, %v261_v11 }
  0x27   : > { %592 = vmatmul.msk.f32.gmra.mxu2 %vm277_vm1, %v265_v12  ;;  %596 = vmatmul.msk.f32.gmra.mxu3 %vm277_vm1, %v269_v13 }
  0x2d   : > { %585 = vmatmul.msk.f32.gmra.mxu0 %vm277_vm1, %v258_v14  ;;  %589 = vmatmul.msk.f32.gmra.mxu1 %vm277_vm1, %v262_v15 }
  0x2f   : > { %593 = vmatmul.msk.f32.gmra.mxu2 %vm277_vm1, %v266_v16  ;;  %597 = vmatmul.msk.f32.gmra.mxu3 %vm277_vm1, %v270_v17 }
  0x35   : > { %586 = vmatmul.msk.f32.gmra.mxu0 %vm277_vm1, %v259_v18  ;;  %590 = vmatmul.msk.f32.gmra.mxu1 %vm277_vm1, %v263_v19 }
  0x37   : > { %594 = vmatmul.msk.f32.gmra.mxu2 %vm277_vm1, %v267_v20  ;;  %598 = vmatmul.msk.f32.gmra.mxu3 %vm277_vm1, %v271_v21 }
  0x9a   : > { %v347_v22 = vpop.f32.mrf.mxu0  ;;  %v359_v23 = vpop.f32.mrf.mxu1 }
  0x9b   : > { %395 = vst [vmem:[%s691_s30] sm:$0xff] %v347_v22  ;;  %v436_v33 = vmul.f32 %v347_v22, %v347_v22  ;;  %v440_v45 = vmul.f32 %v359_v23, %v359_v23 }
  0x9c   : > { %399 = vst [vmem:[%s691_s30 + $0x20] sm:$0xff] %v359_v23 }
  0xa2   : > { %v350_v24 = vpop.f32.mrf.mxu0  ;;  %v362_v25 = vpop.f32.mrf.mxu1 }
  0xa3   : > { %396 = vst [vmem:[%s691_s30 + $0x8] sm:$0xff] %v350_v24  ;;  %v371_v26 = vpop.f32.mrf.mxu2  ;;  %v383_v27 = vpop.f32.mrf.mxu3  ;;  %v437_v32 = vmul.f32 %v350_v24, %v350_v24  ;;  %v412_v34 = vadd.f32 %v350_v24, %v347_v22  ;;  %v441_v48 = vmul.f32 %v362_v25, %v362_v25 }
  0xa4   : > { %400 = vst [vmem:[%s691_s30 + $0x28] sm:$0xff] %v362_v25  ;;  %v444_v59 = vmul.f32 %v371_v26, %v371_v26  ;;  %v448_v7 = vmul.f32 %v383_v27, %v383_v27 }
  0xa5   : > { %403 = vst [vmem:[%s691_s30 + $0x40] sm:$0xff] %v371_v26  ;;  %v452_v36 = vadd.f32 %v437_v32, %v436_v33 }
  0xa6   : > { %407 = vst [vmem:[%s691_s30 + $0x60] sm:$0xff] %v383_v27 }
  0xaa   : > { %v353_v28 = vpop.f32.mrf.mxu0  ;;  %v365_v29 = vpop.f32.mrf.mxu1 }
  0xab   : > { %397 = vst [vmem:[%s691_s30 + $0x10] sm:$0xff] %v353_v28  ;;  %v374_v30 = vpop.f32.mrf.mxu2  ;;  %v386_v31 = vpop.f32.mrf.mxu3  ;;  %v438_v35 = vmul.f32 %v353_v28, %v353_v28  ;;  %v413_v37 = vadd.f32 %v412_v34, %v353_v28  ;;  %v442_v52 = vmul.f32 %v365_v29, %v365_v29 }
  0xac   : > { %401 = vst [vmem:[%s691_s30 + $0x30] sm:$0xff] %v365_v29  ;;  %v445_v62 = vmul.f32 %v374_v30, %v374_v30  ;;  %v449_v10 = vmul.f32 %v386_v31, %v386_v31 }
  0xad   : > { %404 = vst [vmem:[%s691_s30 + $0x48] sm:$0xff] %v374_v30  ;;  %v453_v40 = vadd.f32 %v452_v36, %v438_v35 }
  0xae   : > { %408 = vst [vmem:[%s691_s30 + $0x68] sm:$0xff] %v386_v31 }
  0xb2   : > { %v356_v38 = vpop.f32.mrf.mxu0  ;;  %v368_v39 = vpop.f32.mrf.mxu1 }
  0xb3   : > { %398 = vst [vmem:[%s691_s30 + $0x18] sm:$0xff] %v356_v38  ;;  %v414_v41 = vadd.f32 %v413_v37, %v356_v38  ;;  %v439_v42 = vmul.f32 %v356_v38, %v356_v38  ;;  %v377_v43 = vpop.f32.mrf.mxu2  ;;  %v389_v44 = vpop.f32.mrf.mxu3  ;;  %v443_v54 = vmul.f32 %v368_v39, %v368_v39 }
  0xb4   : > { %402 = vst [vmem:[%s691_s30 + $0x38] sm:$0xff] %v368_v39  ;;  %v446_v2 = vmul.f32 %v377_v43, %v377_v43  ;;  %v450_v14 = vmul.f32 %v389_v44, %v389_v44 }
  0xb5   : > { %v415_v46 = vadd.f32 %v414_v41, %v359_v23  ;;  %v454_v47 = vadd.f32 %v453_v40, %v439_v42  ;;  %405 = vst [vmem:[%s691_s30 + $0x50] sm:$0xff] %v377_v43 }
  0xb6   : > { %409 = vst [vmem:[%s691_s30 + $0x70] sm:$0xff] %v389_v44 }
  0xb7   : > { %v455_v49 = vadd.f32 %v454_v47, %v440_v45  ;;  %v416_v50 = vadd.f32 %v415_v46, %v362_v25 }
  0xb9   : > { %v417_v51 = vadd.f32 %v416_v50, %v365_v29  ;;  %v456_v53 = vadd.f32 %v455_v49, %v441_v48  ;;  %v411_v29 = vld [vmem:[#allocation2] sm:$0x1] }
  0xbb   : > { %v457_v55 = vadd.f32 %v456_v53, %v442_v52  ;;  %v418_v56 = vadd.f32 %v417_v51, %v368_v39  ;;  %v380_v57 = vpop.f32.mrf.mxu2  ;;  %v392_v58 = vpop.f32.mrf.mxu3 }
  0xbc   : > { %406 = vst [vmem:[%s691_s30 + $0x58] sm:$0xff] %v380_v57  ;;  %v447_v4 = vmul.f32 %v380_v57, %v380_v57  ;;  %v451_v16 = vmul.f32 %v392_v58, %v392_v58 }
  0xbd   : > { %v419_v60 = vadd.f32 %v418_v56, %v371_v26  ;;  %v458_v61 = vadd.f32 %v457_v55, %v443_v54  ;;  %410 = vst [vmem:[%s691_s30 + $0x78] sm:$0xff] %v392_v58 }
  0xbf   : > { %v459_v63 = vadd.f32 %v458_v61, %v444_v59  ;;  %v420_v0 = vadd.f32 %v419_v60, %v374_v30 }
  0xc1   : > { %v421_v1 = vadd.f32 %v420_v0, %v377_v43  ;;  %v460_v3 = vadd.f32 %v459_v63, %v445_v62 }
  0xc3   : > { %v461_v5 = vadd.f32 %v460_v3, %v446_v2  ;;  %v422_v6 = vadd.f32 %v421_v1, %v380_v57 }
  0xc5   : > { %v423_v8 = vadd.f32 %v422_v6, %v383_v27  ;;  %v462_v9 = vadd.f32 %v461_v5, %v447_v4 }
  0xc7   : > { %v463_v11 = vadd.f32 %v462_v9, %v448_v7  ;;  %v424_v12 = vadd.f32 %v423_v8, %v386_v31  ;;  %v435_v31 = vld [vmem:[#allocation3] sm:$0x1] }
  0xc9   : > { %v425_v13 = vadd.f32 %v424_v12, %v389_v44  ;;  %v464_v15 = vadd.f32 %v463_v11, %v449_v10 }
  0xcb   : > { %v465_v17 = vadd.f32 %v464_v15, %v450_v14  ;;  %v426_v18 = vadd.f32 %v425_v13, %v392_v58 }
  0xcd   : > { %v427_v19 = vrot.slane %v426_v18, 4  ;;  %v466_v20 = vadd.f32 %v465_v17, %v451_v16 }
  0xcf   : > { %v428_v21 = vadd.f32 %v427_v19, %v426_v18  ;;  %v467_v22 = vrot.slane %v466_v20, 4 }
  0xd1   : > { %v429_v23 = vrot.slane %v428_v21, 2  ;;  %v468_v24 = vadd.f32 %v467_v22, %v466_v20 }
  0xd3   : > { %v430_v25 = vadd.f32 %v429_v23, %v428_v21  ;;  %v469_v26 = vrot.slane %v468_v24, 2 }
  0xd5   : > { %v431_v28 = vrot.slane %v430_v25, 1  ;;  %v470_v27 = vadd.f32 %v469_v26, %v468_v24 }
  0xd7   : > { %v432_v30 = vadd.f32 %v431_v28, %v430_v25  ;;  %v471_v32 = vrot.slane %v470_v27, 1 }
  0xd9   : > { %v433_v33 = vadd.f32 %v432_v30, %v411_v29  ;;  %v472_v34 = vadd.f32 %v471_v32, %v470_v27  ;;  %478 = sbr.rel (%p599_p5) target bundleno = 262 (0x106), region = 44 }
  0xdb   : > { %434 = vst [vmem:[#allocation2] sm:$0x1] %v433_v33  ;;  %v473_v35 = vadd.f32 %v472_v34, %v435_v31 }
  0xdd   : > { %474 = vst [vmem:[#allocation3] sm:$0x1] %v473_v35 }
  0xde   : > { %v486_v49 = vld [vmem:[%s775_s2] sm:$0x1] }
  0xdf   : > { %v500_v53 = vld [vmem:[%s776_s3] sm:$0x1] }
  0xe2   : > { %v479_v36 = vld [vmem:[#allocation2] sm:$0x1] }
  0xe3   : > { %v480_v38 = vmul.f32 0.001953125, %v479_v36 }
  0xe4   : > { %v481_v37 = vld [vmem:[#allocation3] sm:$0x1] }
  0xe5   : > { %v482_v39 = vmul.f32 0.001953125, %v481_v37  ;;  %v483_v40 = vmul.f32 %v480_v38, %v480_v38 }
  0xe7   : > { %v484_v41 = vsub.f32 %v482_v39, %v483_v40 }
  0xe9   : > { %v485_v42 = vmax.f32 %v484_v41, 0.0 }
  0xeb   : > { %v487_v43 = vadd.f32 1e-05, %v485_v42 }
  0xed   : > { %626 = vrsqrt.f32 %v487_v43  ;;  %vm494_vm2 = vweird.f32 %v487_v43 }
  0xf3   : > { %v627_v44 = vpop.eup %626 }
  0xf4   : > { %v489_v45 = vmul.f32 %v627_v44, %v487_v43  ;;  %vm495_vm3 = vweird.f32 %v627_v44 }
  0xf5   : > { %vm496_vm4 = vmor %vm494_vm2, %vm495_vm3 }
  0xf6   : > { %v490_v46 = vmul.f32 %v627_v44, %v489_v45 }
  0xf8   : > { %v491_v47 = vmul.f32 0.5, %v490_v46 }
  0xfa   : > { %v492_v48 = vsub.f32 1.5, %v491_v47 }
  0xfc   : > { %v493_v50 = vmul.f32 %v627_v44, %v492_v48 }
  0xfe   : > { %v497_v51 = vsel %vm496_vm4, %v627_v44, %v493_v50 }
  0xff   : > { %v498_v52 = vmul.f32 %v497_v51, %v486_v49 }
 0x101   : > { %499 = vst [vmem:[%s778_s5] sm:$0x1] %v498_v52  ;;  %v501_v54 = vmul.f32 %v498_v52, %v480_v38 }
 0x103   : > { %v502_v55 = vsub.f32 %v500_v53, %v501_v54 }
 0x105   : > { %503 = vst [vmem:[%s779_s6] sm:$0x1] %v502_v55 }
 0x106 PF: > { %s17_s21 = sadd.s32 1, %s634_s21  }
 0x107   : > { %p14_p6 = scmp.ge.s32.totalorder %s17_s21, 6  }
 0x109   :  { %16 = sbr.rel (!%p14_p6) target bundleno = 1 (0x1), region = 90 }

// kernel: _lambda_.7
= control target key start
LH: loop header
LB: loop body
LE: loop exit
PB: predicated region body
PF: predicated region fallthrough
CT: control target
= control target key end

     0   :  { %s573_s21 = smov 0   ;;  %s736_s0 = inlined_call_operand.vmem [shape: f32[512,128], index: 0, kind: input, shape index: {}]   ;;  %s737_s1 = inlined_call_operand.vmem [shape: f32[512,128], index: 1, kind: input, shape index: {}]   ;;  %s738_s2 = inlined_call_operand.vmem [shape: f32[1,128], index: 2, kind: input, shape index: {}]   ;;  %s739_s3 = inlined_call_operand.vmem [shape: f32[1,128], index: 3, kind: input, shape index: {}]   ;;  %s740_s4 = inlined_call_operand.vmem [shape: f32[1,128], index: 4, kind: input, shape index: {}]   ;;  %s741_s5 = inlined_call_operand.vmem [shape: f32[1,128], index: 5, kind: input, shape index: {}]   ;;  %s742_s6 = inlined_call_operand.vmem [shape: f32[512,128], index: 6, kind: output, shape index: {}]  }
   0x1 LB: > { %s505_s22 = sadd.s32 4294967295, %s536_s21   ;;  %p509_p0 = scmp.ge.s32.totalorder %s536_s21, 1  ;;  %s536_s21 = sphi %s573_s21, %s16_s21  }
   0x2   : > { %p224_p1 = scmp.lt.s32.totalorder %s536_s21, 5 }
   0x4   : > { %p225_p2 = pnand %p509_p0, %p224_p1 }
   0x5   : > { %s510_s23 = sshll.u32 (!%p225_p2), %s505_s22, 4 }
   0x6   : > { %228 = sbr.rel (%p225_p2) target bundleno = 45 (0x2d), region = 44  ;;  %p260_p3 = scmp.lt.s32.totalorder (!%p225_p2), %s510_s23, 63 }
   0xb   : > { %s744_s23 = smov (!%p260_p3, %s510_s23), 63  ;;  %v584_v0 = vld [vmem:[%s738_s2] ss:$0 sm:$0xff] }
   0xc   : > { %v589_v1 = vld [vmem:[%s740_s4] ss:$0 sm:$0xff]  ;;  %s591_s28 = sshll.u32 %s744_s23, 3 }
   0xd   : > { %s597_s7 = scalar_lea.vmem %s736_s0, %s591_s28  ;;  %s603_s10 = scalar_lea.vmem %s737_s1, %s591_s28  ;;  %v608_v2 = vld [vmem:[%s739_s3] ss:$0 sm:$0xff] }
   0xe   : > { %v613_v3 = vld [vmem:[%s741_s5] ss:$0 sm:$0xff]  ;;  %v278_v6 = vld [vmem:[%s597_s7 + $0x8] sm:$0xff]  ;;  %v279_v11 = vld [vmem:[%s597_s7 + $0x10] sm:$0xff]  ;;  %s648_s17 = scalar_lea.vmem %s742_s6, %s591_s28 }
   0xf   : > { %v277_v4 = vld [vmem:[%s597_s7] sm:$0xff]  ;;  %v298_v9 = vmul.f32 %v584_v0, %v278_v6  ;;  %v334_v10 = vld [vmem:[%s603_s10 + $0x8] sm:$0xff]  ;;  %v335_v12 = vld [vmem:[%s603_s10 + $0x10] sm:$0xff]  ;;  %v299_v14 = vmul.f32 %v584_v0, %v279_v11 }
  0x10   : > { %v333_v5 = vld [vmem:[%s603_s10] sm:$0xff]  ;;  %v297_v7 = vmul.f32 %v584_v0, %v277_v4  ;;  %v354_v13 = vmul.f32 %v589_v1, %v334_v10  ;;  %v355_v15 = vmul.f32 %v589_v1, %v335_v12  ;;  %v280_v16 = vld [vmem:[%s597_s7 + $0x18] sm:$0xff]  ;;  %v282_v24 = vld [vmem:[%s597_s7 + $0x28] sm:$0xff] }
  0x11   : > { %v353_v8 = vmul.f32 %v589_v1, %v333_v5  ;;  %v336_v17 = vld [vmem:[%s603_s10 + $0x18] sm:$0xff]  ;;  %v281_v18 = vld [vmem:[%s597_s7 + $0x20] sm:$0xff]  ;;  %v318_v21 = vadd.f32 %v608_v2, %v298_v9  ;;  %v300_v22 = vmul.f32 %v584_v0, %v280_v16  ;;  %v319_v26 = vadd.f32 %v608_v2, %v299_v14  ;;  %v338_v29 = vld [vmem:[%s603_s10 + $0x28] sm:$0xff] }
  0x12   : > { %v317_v19 = vadd.f32 %v608_v2, %v297_v7  ;;  %v337_v23 = vld [vmem:[%s603_s10 + $0x20] sm:$0xff]  ;;  %v374_v25 = vadd.f32 %v613_v3, %v354_v13  ;;  %v375_v27 = vadd.f32 %v613_v3, %v355_v15  ;;  %v356_v28 = vmul.f32 %v589_v1, %v336_v17  ;;  %v283_v38 = vld [vmem:[%s597_s7 + $0x30] sm:$0xff]  ;;  %v284_v44 = vld [vmem:[%s597_s7 + $0x38] sm:$0xff] }
  0x13   : > { %v373_v20 = vadd.f32 %v613_v3, %v353_v8  ;;  %v320_v31 = vadd.f32 %v608_v2, %v300_v22  ;;  %v301_v32 = vmul.f32 %v584_v0, %v281_v18  ;;  %v357_v33 = vmul.f32 %v589_v1, %v337_v23  ;;  %v339_v39 = vld [vmem:[%s603_s10 + $0x30] sm:$0xff]  ;;  %v340_v45 = vld [vmem:[%s603_s10 + $0x38] sm:$0xff]  ;;  %v285_v46 = vld [vmem:[%s597_s7 + $0x40] sm:$0xff] }
  0x14   : > { %v390_v34 = vadd.f32 %v374_v25, %v318_v21  ;;  %v391_v35 = vadd.f32 %v375_v27, %v319_v26  ;;  %v376_v36 = vadd.f32 %v613_v3, %v356_v28  ;;  %v302_v37 = vmul.f32 %v584_v0, %v282_v24  ;;  %v341_v55 = vld [vmem:[%s603_s10 + $0x40] sm:$0xff]  ;;  %v286_v60 = vld [vmem:[%s597_s7 + $0x48] sm:$0xff]  ;;  %v287_v6 = vld [vmem:[%s597_s7 + $0x50] sm:$0xff] }
  0x15   : > { %v389_v30 = vadd.f32 %v373_v20, %v317_v19  ;;  %v321_v41 = vadd.f32 %v608_v2, %v301_v32  ;;  %v377_v42 = vadd.f32 %v613_v3, %v357_v33  ;;  %v358_v43 = vmul.f32 %v589_v1, %v338_v29  ;;  %v342_v61 = vld [vmem:[%s603_s10 + $0x48] sm:$0xff]  ;;  %v343_v7 = vld [vmem:[%s603_s10 + $0x50] sm:$0xff]  ;;  %v288_v12 = vld [vmem:[%s597_s7 + $0x58] sm:$0xff] }
  0x16   : > { %v406_v47 = vmax.f32 %v390_v34, 0.0  ;;  %v407_v48 = vmax.f32 %v391_v35, 0.0  ;;  %v392_v49 = vadd.f32 %v376_v36, %v320_v31  ;;  %v322_v50 = vadd.f32 %v608_v2, %v302_v37  ;;  %v344_v21 = vld [vmem:[%s603_s10 + $0x58] sm:$0xff]  ;;  %v289_v22 = vld [vmem:[%s597_s7 + $0x60] sm:$0xff]  ;;  %v290_v28 = vld [vmem:[%s597_s7 + $0x68] sm:$0xff] }
  0x17   : > { %v405_v40 = vmax.f32 %v389_v30, 0.0  ;;  %v393_v51 = vadd.f32 %v377_v42, %v321_v41  ;;  %v378_v52 = vadd.f32 %v613_v3, %v358_v43  ;;  %v303_v53 = vmul.f32 %v584_v0, %v283_v38  ;;  %v345_v27 = vld [vmem:[%s603_s10 + $0x60] sm:$0xff]  ;;  %v346_v33 = vld [vmem:[%s603_s10 + $0x68] sm:$0xff]  ;;  %v291_v38 = vld [vmem:[%s597_s7 + $0x70] sm:$0xff] }
  0x18   : > { %v359_v54 = vmul.f32 %v589_v1, %v339_v39  ;;  %422 = vst [vmem:[%s648_s17 + $0x8] sm:$0xff] %v406_v47  ;;  %v408_v56 = vmax.f32 %v392_v49, 0.0  ;;  %v304_v57 = vmul.f32 %v584_v0, %v284_v44  ;;  %v360_v58 = vmul.f32 %v589_v1, %v340_v45  ;;  %v347_v43 = vld [vmem:[%s603_s10 + $0x70] sm:$0xff]  ;;  %v292_v44 = vld [vmem:[%s597_s7 + $0x78] sm:$0xff] }
  0x19   : > { %421 = vst [vmem:[%s648_s17] sm:$0xff] %v405_v40  ;;  %v305_v59 = vmul.f32 %v584_v0, %v285_v46  ;;  %v409_v62 = vmax.f32 %v393_v51, 0.0  ;;  %v394_v63 = vadd.f32 %v378_v52, %v322_v50  ;;  %v323_v4 = vadd.f32 %v608_v2, %v303_v53  ;;  %v348_v49 = vld [vmem:[%s603_s10 + $0x78] sm:$0xff] }
  0x1a   : > { %423 = vst [vmem:[%s648_s17 + $0x10] sm:$0xff] %v407_v48  ;;  %v379_v5 = vadd.f32 %v613_v3, %v359_v54  ;;  %v324_v8 = vadd.f32 %v608_v2, %v304_v57  ;;  %v380_v9 = vadd.f32 %v613_v3, %v360_v58  ;;  %v361_v11 = vmul.f32 %v589_v1, %v341_v55 }
  0x1b   : > { %424 = vst [vmem:[%s648_s17 + $0x18] sm:$0xff] %v408_v56  ;;  %v325_v10 = vadd.f32 %v608_v2, %v305_v59  ;;  %v410_v13 = vmax.f32 %v394_v63, 0.0  ;;  %v306_v15 = vmul.f32 %v584_v0, %v286_v60  ;;  %v362_v16 = vmul.f32 %v589_v1, %v342_v61 }
  0x1c   : > { %425 = vst [vmem:[%s648_s17 + $0x20] sm:$0xff] %v409_v62  ;;  %v395_v14 = vadd.f32 %v379_v5, %v323_v4  ;;  %v396_v17 = vadd.f32 %v380_v9, %v324_v8  ;;  %v381_v18 = vadd.f32 %v613_v3, %v361_v11  ;;  %v307_v19 = vmul.f32 %v584_v0, %v287_v6 }
  0x1d   : > { %v363_v20 = vmul.f32 %v589_v1, %v343_v7  ;;  %426 = vst [vmem:[%s648_s17 + $0x28] sm:$0xff] %v410_v13  ;;  %v326_v24 = vadd.f32 %v608_v2, %v306_v15  ;;  %v382_v25 = vadd.f32 %v613_v3, %v362_v16  ;;  %v308_v26 = vmul.f32 %v584_v0, %v288_v12 }
  0x1e   : > { %v411_v23 = vmax.f32 %v395_v14, 0.0  ;;  %v412_v29 = vmax.f32 %v396_v17, 0.0  ;;  %v397_v30 = vadd.f32 %v381_v18, %v325_v10  ;;  %v327_v31 = vadd.f32 %v608_v2, %v307_v19 }
  0x1f   : > { %v383_v32 = vadd.f32 %v613_v3, %v363_v20  ;;  %v398_v34 = vadd.f32 %v382_v25, %v326_v24  ;;  %v328_v35 = vadd.f32 %v608_v2, %v308_v26  ;;  %v364_v36 = vmul.f32 %v589_v1, %v344_v21 }
  0x20   : > { %427 = vst [vmem:[%s648_s17 + $0x30] sm:$0xff] %v411_v23  ;;  %v309_v37 = vmul.f32 %v584_v0, %v289_v22  ;;  %v413_v39 = vmax.f32 %v397_v30, 0.0  ;;  %v365_v41 = vmul.f32 %v589_v1, %v345_v27  ;;  %v310_v42 = vmul.f32 %v584_v0, %v290_v28 }
  0x21   : > { %428 = vst [vmem:[%s648_s17 + $0x38] sm:$0xff] %v412_v29  ;;  %v399_v40 = vadd.f32 %v383_v32, %v327_v31  ;;  %v414_v45 = vmax.f32 %v398_v34, 0.0  ;;  %v384_v46 = vadd.f32 %v613_v3, %v364_v36  ;;  %v366_v48 = vmul.f32 %v589_v1, %v346_v33 }
  0x22   : > { %v329_v47 = vadd.f32 %v608_v2, %v309_v37  ;;  %429 = vst [vmem:[%s648_s17 + $0x40] sm:$0xff] %v413_v39  ;;  %v385_v51 = vadd.f32 %v613_v3, %v365_v41  ;;  %v330_v52 = vadd.f32 %v608_v2, %v310_v42  ;;  %v311_v53 = vmul.f32 %v584_v0, %v291_v38 }
  0x23   : > { %v415_v50 = vmax.f32 %v399_v40, 0.0  ;;  %430 = vst [vmem:[%s648_s17 + $0x48] sm:$0xff] %v414_v45  ;;  %v400_v54 = vadd.f32 %v384_v46, %v328_v35  ;;  %v386_v55 = vadd.f32 %v613_v3, %v366_v48  ;;  %v367_v56 = vmul.f32 %v589_v1, %v347_v43 }
  0x24   : > { %v312_v57 = vmul.f32 %v584_v0, %v292_v44  ;;  %v401_v58 = vadd.f32 %v385_v51, %v329_v47  ;;  %v331_v59 = vadd.f32 %v608_v2, %v311_v53  ;;  %v368_v60 = vmul.f32 %v589_v1, %v348_v49 }
  0x25   : > { %431 = vst [vmem:[%s648_s17 + $0x50] sm:$0xff] %v415_v50  ;;  %v416_v61 = vmax.f32 %v400_v54, 0.0  ;;  %v402_v62 = vadd.f32 %v386_v55, %v330_v52  ;;  %v387_v63 = vadd.f32 %v613_v3, %v367_v56 }
  0x26   : > { %v332_v4 = vadd.f32 %v608_v2, %v312_v57  ;;  %v417_v5 = vmax.f32 %v401_v58, 0.0  ;;  %v388_v6 = vadd.f32 %v613_v3, %v368_v60 }
  0x27   : > { %432 = vst [vmem:[%s648_s17 + $0x58] sm:$0xff] %v416_v61  ;;  %v418_v0 = vmax.f32 %v402_v62, 0.0  ;;  %v403_v7 = vadd.f32 %v387_v63, %v331_v59 }
  0x28   : > { %433 = vst [vmem:[%s648_s17 + $0x60] sm:$0xff] %v417_v5  ;;  %v404_v8 = vadd.f32 %v388_v6, %v332_v4 }
  0x29   : > { %434 = vst [vmem:[%s648_s17 + $0x68] sm:$0xff] %v418_v0  ;;  %v419_v9 = vmax.f32 %v403_v7, 0.0 }
  0x2a   : > { %v420_v10 = vmax.f32 %v404_v8, 0.0 }
  0x2b   : > { %435 = vst [vmem:[%s648_s17 + $0x70] sm:$0xff] %v419_v9 }
  0x2c   : > { %436 = vst [vmem:[%s648_s17 + $0x78] sm:$0xff] %v420_v10 }
  0x2d PF: > { %s16_s21 = sadd.s32 1, %s536_s21  }
  0x2e   : > { %p13_p4 = scmp.ge.s32.totalorder %s16_s21, 6  }
  0x30   :  { %15 = sbr.rel (!%p13_p4) target bundleno = 1 (0x1), region = 77 }

// kernel: _lambda_.6
= control target key start
LH: loop header
LB: loop body
LE: loop exit
PB: predicated region body
PF: predicated region fallthrough
CT: control target
= control target key end

     0   :  { %s1251_s25 = smov 0   ;;  %s1499_s0 = inlined_call_operand.vmem [shape: f32[512,72], index: 0, kind: input, shape index: {}]   ;;  %s1500_s1 = inlined_call_operand.vmem [shape: f32[72,128], index: 1, kind: input, shape index: {}]   ;;  %s1501_s2 = inlined_call_operand.vmem [shape: f32[1,128], index: 2, kind: input, shape index: {}]   ;;  %s1502_s3 = inlined_call_operand.vmem [shape: f32[1,128], index: 3, kind: input, shape index: {}]   ;;  %s1503_s4 = inlined_call_operand.vmem [shape: f32[512,4], index: 4, kind: input, shape index: {}]   ;;  %s1504_s5 = inlined_call_operand.vmem [shape: f32[4,128], index: 5, kind: input, shape index: {}]   ;;  %s1505_s6 = inlined_call_operand.vmem [shape: f32[1,128], index: 6, kind: input, shape index: {}]   ;;  %s1506_s7 = inlined_call_operand.vmem [shape: f32[1,128], index: 7, kind: input, shape index: {}]   ;;  %s1507_s8 = inlined_call_operand.vmem [shape: f32[512,128], index: 8, kind: output, shape index: {0}]   ;;  %s1508_s9 = inlined_call_operand.vmem [shape: f32[512,128], index: 9, kind: output, shape index: {1}]   ;;  %s1509_s10 = inlined_call_operand.vmem [shape: f32[1,128], index: 10, kind: output, shape index: {2}]   ;;  %s1510_s11 = inlined_call_operand.vmem [shape: f32[1,128], index: 11, kind: output, shape index: {3}]   ;;  %s1511_s12 = inlined_call_operand.vmem [shape: f32[1,128], index: 12, kind: output, shape index: {4}]   ;;  %s1512_s13 = inlined_call_operand.vmem [shape: f32[1,128], index: 13, kind: output, shape index: {5}]  }
   0x1 LB: > { %s1257_s26 = sadd.s32 4294967295, %s1178_s25   ;;  %p1094_p0 = scmp.ge.s32.totalorder %s1178_s25, 1  ;;  %s1178_s25 = sphi %s1251_s25, %s24_s25  }
   0x2   : > { %p390_p1 = scmp.lt.s32.totalorder %s1178_s25, 5 }
   0x4   : > { %p391_p2 = pnand %p1094_p0, %p390_p1 }
   0x5   : > { %s1095_s27 = sshll.u32 (!%p391_p2), %s1257_s26, 4  ;;  %p1103_p4 = scmp.ne.s32.totalorder (!%p391_p2), %s1257_s26, 0 }
   0x6   : > { %394 = sbr.rel (%p391_p2) target bundleno = 292 (0x124), region = 52  ;;  %p445_p3 = scmp.lt.s32.totalorder (!%p391_p2), %s1095_s27, 63 }
   0xb   : > { %s1514_s27 = smov (!%p445_p3, %s1095_s27), 63  ;;  %471 = sbr.rel (%p1103_p4) target bundleno = 21 (0x15), region = 56 }
   0xc   : > { %s1096_s28 = sshll.u32 %s1514_s27, 3 }
   0xd   : > { %s1265_s14 = scalar_lea.vmem %s1499_s0, %s1096_s28  ;;  %s1270_s17 = scalar_lea.vmem %s1503_s4, %s1096_s28 }
   0xe   : > { %s1275_s20 = scalar_lea.vmem %s1507_s8, %s1096_s28  ;;  %s1280_s23 = scalar_lea.vmem %s1508_s9, %s1096_s28 }
  0x10   : > { %v1180_v0 = vmov 0.0  }
  0x11   : > { %472 = vst [vmem:[#allocation2] sm:$0x1] %v1180_v0 }
  0x12   : > { %473 = vst [vmem:[#allocation3] sm:$0x1] %v1180_v0 }
  0x13   : > { %474 = vst [vmem:[#allocation4] sm:$0x1] %v1180_v0 }
  0x14   : > { %475 = vst [vmem:[#allocation5] sm:$0x1] %v1180_v0 }
  0x15 PF: > { %v500_v1 = vld [vmem:[%s1500_s1 + $0x40] sm:$0xff]  ;;  %vm681_vm0 = vcmask 1043456   ;;  %vm632_vm1 = vcmask 31744   ;;  %v499_v4 = vld [vmem:[%s1500_s1 + $0x38] sm:$0xff]  ;;  %v498_v5 = vld [vmem:[%s1500_s1 + $0x30] sm:$0xff]  ;;  %vm501_vm2 = vcmask 588800  }
  0x16   : > { %v631_v2 = vld [vmem:[%s1504_s5] sm:$0xf]  ;;  %557 = vmatpush.msra.mxu0 %v500_v1  ;;  %1141 = vmatpush.msra.mxu3 %v500_v1  ;;  %v497_v6 = vld [vmem:[%s1500_s1 + $0x28] sm:$0xff]  ;;  %v495_v9 = vld [vmem:[%s1500_s1 + $0x18] sm:$0xff]  ;;  %p1137_p5 = scmp.ne.s32.totalorder %s1257_s26, 3 }
  0x17   : > { %v615_v3 = vld [vmem:[%s1270_s17] sm:$0xff]  ;;  %1120 = vmatpush.msk.msra.mxu1 %vm681_vm0, %v631_v2  ;;  %1140 = vmatpush.msra.mxu2 %v500_v1  ;;  %v616_v8 = vld [vmem:[%s1270_s17 + $0x8] sm:$0xff]  ;;  %v494_v10 = vld [vmem:[%s1500_s1 + $0x10] sm:$0xff] }
  0x18   : > { %1121 = vmatmul.msk.f32.vlgmr.msra.gmra.mxu1 %vm632_vm1, %v615_v3  ;;  %558 = vmatpush.msra.mxu0 %v499_v4  ;;  %v496_v7 = vld [vmem:[%s1500_s1 + $0x20] sm:$0xff]  ;;  %v493_v11 = vld [vmem:[%s1500_s1 + $0x8] sm:$0xff]  ;;  %v491_v14 = vld [vmem:[%s1265_s14 + $0x78] sm:$0xff] }
  0x19   : > { %1143 = vmatpush.msra.mxu3 %v499_v4  ;;  %1142 = vmatpush.msra.mxu2 %v499_v4  ;;  %v492_v12 = vld [vmem:[%s1500_s1] sm:$0xff]  ;;  %v617_v15 = vld [vmem:[%s1270_s17 + $0x10] sm:$0xff]  ;;  %v483_v16 = vld [vmem:[%s1265_s14 + $0x38] sm:$0xff] }
  0x1a   : > { %559 = vmatpush.msra.mxu0 %v498_v5  ;;  %v476_v13 = vld [vmem:[%s1265_s14] sm:$0xff]  ;;  %v477_v17 = vld [vmem:[%s1265_s14 + $0x8] sm:$0xff]  ;;  %v618_v18 = vld [vmem:[%s1270_s17 + $0x18] sm:$0xff] }
  0x1b   : > { %1145 = vmatpush.msra.mxu3 %v498_v5  ;;  %1144 = vmatpush.msra.mxu2 %v498_v5  ;;  %v624_v19 = vld [vmem:[%s1270_s17 + $0x48] sm:$0xff]  ;;  %v484_v20 = vld [vmem:[%s1265_s14 + $0x40] sm:$0xff]  ;;  %v478_v21 = vld [vmem:[%s1265_s14 + $0x10] sm:$0xff] }
  0x1c   : > { %560 = vmatpush.msra.mxu0 %v497_v6  ;;  %v619_v22 = vld [vmem:[%s1270_s17 + $0x20] sm:$0xff]  ;;  %v625_v23 = vld [vmem:[%s1270_s17 + $0x50] sm:$0xff]  ;;  %v485_v24 = vld [vmem:[%s1265_s14 + $0x48] sm:$0xff] }
  0x1d   : > { %1147 = vmatpush.msra.mxu3 %v497_v6  ;;  %1146 = vmatpush.msra.mxu2 %v497_v6  ;;  %v479_v25 = vld [vmem:[%s1265_s14 + $0x18] sm:$0xff]  ;;  %v620_v26 = vld [vmem:[%s1270_s17 + $0x28] sm:$0xff]  ;;  %v486_v28 = vld [vmem:[%s1265_s14 + $0x50] sm:$0xff] }
  0x1e   : > { %561 = vmatpush.msra.mxu0 %v496_v7  ;;  %v626_v27 = vld [vmem:[%s1270_s17 + $0x58] sm:$0xff]  ;;  %v480_v29 = vld [vmem:[%s1265_s14 + $0x20] sm:$0xff]  ;;  %v621_v30 = vld [vmem:[%s1270_s17 + $0x30] sm:$0xff] }
  0x1f   : > { %1149 = vmatpush.msra.mxu3 %v496_v7  ;;  %1148 = vmatpush.msra.mxu2 %v496_v7  ;;  %v627_v31 = vld [vmem:[%s1270_s17 + $0x60] sm:$0xff]  ;;  %v487_v32 = vld [vmem:[%s1265_s14 + $0x58] sm:$0xff]  ;;  %v481_v33 = vld [vmem:[%s1265_s14 + $0x28] sm:$0xff] }
  0x20   : > { %1122 = vmatmul.msk.f32.gmra.mxu1 %vm632_vm1, %v616_v8  ;;  %562 = vmatpush.msra.mxu0 %v495_v9  ;;  %v622_v34 = vld [vmem:[%s1270_s17 + $0x38] sm:$0xff]  ;;  %v628_v35 = vld [vmem:[%s1270_s17 + $0x68] sm:$0xff]  ;;  %v488_v36 = vld [vmem:[%s1265_s14 + $0x60] sm:$0xff] }
  0x21   : > { %1151 = vmatpush.msra.mxu3 %v495_v9  ;;  %1150 = vmatpush.msra.mxu2 %v495_v9  ;;  %v482_v37 = vld [vmem:[%s1265_s14 + $0x30] sm:$0xff]  ;;  %v623_v38 = vld [vmem:[%s1270_s17 + $0x40] sm:$0xff]  ;;  %v489_v40 = vld [vmem:[%s1265_s14 + $0x68] sm:$0xff] }
  0x22   : > { %563 = vmatpush.msra.mxu0 %v494_v10  ;;  %v629_v39 = vld [vmem:[%s1270_s17 + $0x70] sm:$0xff]  ;;  %v630_v41 = vld [vmem:[%s1270_s17 + $0x78] sm:$0xff] }
  0x23   : > { %1153 = vmatpush.msra.mxu3 %v494_v10  ;;  %1152 = vmatpush.msra.mxu2 %v494_v10  ;;  %v490_v42 = vld [vmem:[%s1265_s14 + $0x70] sm:$0xff] }
  0x24   : > { %564 = vmatpush.msra.mxu0 %v493_v11 }
  0x25   : > { %1155 = vmatpush.msra.mxu3 %v493_v11  ;;  %1154 = vmatpush.msra.mxu2 %v493_v11 }
  0x26   : > { %565 = vmatpush.msra.mxu0 %v492_v12 }
  0x27   : > { %1157 = vmatpush.msra.mxu3 %v492_v12  ;;  %1104 = vmatmul.msk.f32.vlgmr.msra.gmra.mxu0 %vm501_vm2, %v476_v13 }
  0x28   : > { %1119 = vmatmul.msk.f32.vlgmr.msra.gmra.mxu3 %vm501_vm2, %v491_v14  ;;  %1123 = vmatmul.msk.f32.gmra.mxu1 %vm632_vm1, %v617_v15 }
  0x29   : > { %1156 = vmatpush.msra.mxu2 %v492_v12  ;;  %1158 = vmatpush.msk.msrb.mxu3 %vm681_vm0, %v631_v2 }
  0x2a   : > { %1111 = vmatmul.msk.f32.vlgmr.msra.gmra.mxu2 %vm501_vm2, %v483_v16 }
  0x2f   : > { %1105 = vmatmul.msk.f32.gmra.mxu0 %vm501_vm2, %v477_v17 }
  0x30   : > { %1124 = vmatmul.msk.f32.gmra.mxu1 %vm632_vm1, %v618_v18  ;;  %1130 = vmatmul.msk.f32.vlgmr.msrb.gmra.mxu3 %vm632_vm1, %v624_v19 }
  0x32   : > { %1112 = vmatmul.msk.f32.gmra.mxu2 %vm501_vm2, %v484_v20 }
  0x37   : > { %1106 = vmatmul.msk.f32.gmra.mxu0 %vm501_vm2, %v478_v21 }
  0x38   : > { %1125 = vmatmul.msk.f32.gmra.mxu1 %vm632_vm1, %v619_v22  ;;  %1131 = vmatmul.msk.f32.gmra.mxu3 %vm632_vm1, %v625_v23 }
  0x3a   : > { %1113 = vmatmul.msk.f32.gmra.mxu2 %vm501_vm2, %v485_v24 }
  0x3f   : > { %1107 = vmatmul.msk.f32.gmra.mxu0 %vm501_vm2, %v479_v25 }
  0x40   : > { %1126 = vmatmul.msk.f32.gmra.mxu1 %vm632_vm1, %v620_v26  ;;  %1132 = vmatmul.msk.f32.gmra.mxu3 %vm632_vm1, %v626_v27 }
  0x42   : > { %1114 = vmatmul.msk.f32.gmra.mxu2 %vm501_vm2, %v486_v28 }
  0x47   : > { %1108 = vmatmul.msk.f32.gmra.mxu0 %vm501_vm2, %v480_v29 }
  0x48   : > { %1127 = vmatmul.msk.f32.gmra.mxu1 %vm632_vm1, %v621_v30  ;;  %1133 = vmatmul.msk.f32.gmra.mxu3 %vm632_vm1, %v627_v31 }
  0x4a   : > { %1115 = vmatmul.msk.f32.gmra.mxu2 %vm501_vm2, %v487_v32 }
  0x4f   : > { %1109 = vmatmul.msk.f32.gmra.mxu0 %vm501_vm2, %v481_v33 }
  0x50   : > { %1128 = vmatmul.msk.f32.gmra.mxu1 %vm632_vm1, %v622_v34  ;;  %1134 = vmatmul.msk.f32.gmra.mxu3 %vm632_vm1, %v628_v35 }
  0x52   : > { %1116 = vmatmul.msk.f32.gmra.mxu2 %vm501_vm2, %v488_v36 }
  0x57   : > { %1110 = vmatmul.msk.f32.gmra.mxu0 %vm501_vm2, %v482_v37 }
  0x58   : > { %1129 = vmatmul.msk.f32.gmra.mxu1 %vm632_vm1, %v623_v38  ;;  %1135 = vmatmul.msk.f32.gmra.mxu3 %vm632_vm1, %v629_v39 }
  0x5a   : > { %1117 = vmatmul.msk.f32.gmra.mxu2 %vm501_vm2, %v489_v40 }
  0x60   : > { %1136 = vmatmul.msk.f32.gmra.mxu3 %vm632_vm1, %v630_v41 }
  0x62   : > { %1118 = vmatmul.msk.f32.gmra.mxu2 %vm501_vm2, %v490_v42 }
  0x95   : > { %v702_v43 = vpop.f32.mrf.mxu1 }
  0x96   : > { %766 = vst [vmem:[%s1280_s23] sm:$0xff] %v702_v43  ;;  %v871_v0 = vmul.f32 %v702_v43, %v702_v43 }
  0x9d   : > { %v705_v44 = vpop.f32.mrf.mxu1 }
  0x9e   : > { %767 = vst [vmem:[%s1280_s23 + $0x8] sm:$0xff] %v705_v44  ;;  %v872_v63 = vmul.f32 %v705_v44, %v705_v44  ;;  %v847_v1 = vadd.f32 %v705_v44, %v702_v43 }
  0xa0   : > { %v887_v4 = vadd.f32 %v872_v63, %v871_v0 }
  0xa4   : > { %v567_v45 = vpop.f32.mrf.mxu0 }
  0xa5   : > { %750 = vst [vmem:[%s1275_s20] sm:$0xff] %v567_v45  ;;  %v708_v46 = vpop.f32.mrf.mxu1  ;;  %v807_v7 = vmul.f32 %v567_v45, %v567_v45 }
  0xa6   : > { %768 = vst [vmem:[%s1280_s23 + $0x10] sm:$0xff] %v708_v46  ;;  %v873_v2 = vmul.f32 %v708_v46, %v708_v46  ;;  %v848_v5 = vadd.f32 %v847_v1, %v708_v46 }
  0xa8   : > { %v888_v11 = vadd.f32 %v887_v4, %v873_v2 }
  0xab   : > { %v1383_v47 = vpop.f32.mrf.mxu3 }
  0xac   : > { %765 = vst [vmem:[%s1275_s20 + $0x78] sm:$0xff] %v1383_v47  ;;  %v570_v48 = vpop.f32.mrf.mxu0 }
  0xad   : > { %751 = vst [vmem:[%s1275_s20 + $0x8] sm:$0xff] %v570_v48  ;;  %v1388_v49 = vpop.f32.mrf.mxu2  ;;  %v711_v50 = vpop.f32.mrf.mxu1  ;;  %v808_v3 = vmul.f32 %v570_v48, %v570_v48  ;;  %v783_v8 = vadd.f32 %v570_v48, %v567_v45 }
  0xae   : > { %757 = vst [vmem:[%s1275_s20 + $0x38] sm:$0xff] %v1388_v49  ;;  %v874_v6 = vmul.f32 %v711_v50, %v711_v50  ;;  %v849_v12 = vadd.f32 %v848_v5, %v711_v50 }
  0xaf   : > { %769 = vst [vmem:[%s1280_s23 + $0x18] sm:$0xff] %v711_v50  ;;  %v823_v15 = vadd.f32 %v808_v3, %v807_v7 }
  0xb0   : > { %v889_v20 = vadd.f32 %v888_v11, %v874_v6 }
  0xb3   : > { %v1393_v51 = vpop.f32.mrf.mxu3 }
  0xb4   : > { %775 = vst [vmem:[%s1280_s23 + $0x48] sm:$0xff] %v1393_v51  ;;  %v573_v52 = vpop.f32.mrf.mxu0 }
  0xb5   : > { %752 = vst [vmem:[%s1275_s20 + $0x10] sm:$0xff] %v573_v52  ;;  %v1398_v53 = vpop.f32.mrf.mxu2  ;;  %v714_v54 = vpop.f32.mrf.mxu1  ;;  %v809_v9 = vmul.f32 %v573_v52, %v573_v52  ;;  %v784_v16 = vadd.f32 %v783_v8, %v573_v52  ;;  %v814_v52 = vmul.f32 %v1388_v49, %v1388_v49 }
  0xb6   : > { %758 = vst [vmem:[%s1275_s20 + $0x40] sm:$0xff] %v1398_v53  ;;  %v875_v13 = vmul.f32 %v714_v54, %v714_v54  ;;  %v850_v21 = vadd.f32 %v849_v12, %v714_v54  ;;  %v815_v63 = vmul.f32 %v1398_v53, %v1398_v53 }
  0xb7   : > { %770 = vst [vmem:[%s1280_s23 + $0x20] sm:$0xff] %v714_v54  ;;  %v824_v23 = vadd.f32 %v823_v15, %v809_v9 }
  0xb8   : > { %v890_v26 = vadd.f32 %v889_v20, %v875_v13 }
  0xbb   : > { %v1403_v55 = vpop.f32.mrf.mxu3 }
  0xbc   : > { %776 = vst [vmem:[%s1280_s23 + $0x50] sm:$0xff] %v1403_v55  ;;  %v576_v56 = vpop.f32.mrf.mxu0  ;;  %v881_v2 = vmul.f32 %v1403_v55, %v1403_v55 }
  0xbd   : > { %753 = vst [vmem:[%s1275_s20 + $0x18] sm:$0xff] %v576_v56  ;;  %v1408_v57 = vpop.f32.mrf.mxu2  ;;  %v717_v58 = vpop.f32.mrf.mxu1  ;;  %v810_v17 = vmul.f32 %v576_v56, %v576_v56  ;;  %v785_v24 = vadd.f32 %v784_v16, %v576_v56 }
  0xbe   : > { %759 = vst [vmem:[%s1275_s20 + $0x48] sm:$0xff] %v1408_v57  ;;  %v876_v22 = vmul.f32 %v717_v58, %v717_v58  ;;  %v851_v27 = vadd.f32 %v850_v21, %v717_v58  ;;  %v816_v4 = vmul.f32 %v1408_v57, %v1408_v57 }
  0xbf   : > { %771 = vst [vmem:[%s1280_s23 + $0x28] sm:$0xff] %v717_v58  ;;  %v825_v29 = vadd.f32 %v824_v23, %v810_v17  ;;  %v880_v58 = vmul.f32 %v1393_v51, %v1393_v51 }
  0xc0   : > { %v891_v32 = vadd.f32 %v890_v26, %v876_v22 }
  0xc3   : > { %v1413_v59 = vpop.f32.mrf.mxu3 }
  0xc4   : > { %777 = vst [vmem:[%s1280_s23 + $0x58] sm:$0xff] %v1413_v59  ;;  %v579_v60 = vpop.f32.mrf.mxu0  ;;  %v882_v7 = vmul.f32 %v1413_v59, %v1413_v59 }
  0xc5   : > { %754 = vst [vmem:[%s1275_s20 + $0x20] sm:$0xff] %v579_v60  ;;  %v1418_v61 = vpop.f32.mrf.mxu2  ;;  %v720_v62 = vpop.f32.mrf.mxu1  ;;  %v811_v25 = vmul.f32 %v579_v60, %v579_v60  ;;  %v786_v30 = vadd.f32 %v785_v24, %v579_v60 }
  0xc6   : > { %760 = vst [vmem:[%s1275_s20 + $0x50] sm:$0xff] %v1418_v61  ;;  %v877_v28 = vmul.f32 %v720_v62, %v720_v62  ;;  %v852_v33 = vadd.f32 %v851_v27, %v720_v62  ;;  %v817_v9 = vmul.f32 %v1418_v61, %v1418_v61 }
  0xc7   : > { %772 = vst [vmem:[%s1280_s23 + $0x30] sm:$0xff] %v720_v62  ;;  %v826_v35 = vadd.f32 %v825_v29, %v811_v25 }
  0xc8   : > { %v892_v38 = vadd.f32 %v891_v32, %v877_v28 }
  0xcb   : > { %v1423_v10 = vpop.f32.mrf.mxu3 }
  0xcc   : > { %778 = vst [vmem:[%s1280_s23 + $0x60] sm:$0xff] %v1423_v10  ;;  %v582_v14 = vpop.f32.mrf.mxu0  ;;  %v883_v13 = vmul.f32 %v1423_v10, %v1423_v10 }
  0xcd   : > { %755 = vst [vmem:[%s1275_s20 + $0x28] sm:$0xff] %v582_v14  ;;  %v1428_v18 = vpop.f32.mrf.mxu2  ;;  %v723_v19 = vpop.f32.mrf.mxu1  ;;  %v812_v31 = vmul.f32 %v582_v14, %v582_v14  ;;  %v787_v36 = vadd.f32 %v786_v30, %v582_v14 }
  0xce   : > { %761 = vst [vmem:[%s1275_s20 + $0x58] sm:$0xff] %v1428_v18  ;;  %v878_v34 = vmul.f32 %v723_v19, %v723_v19  ;;  %v853_v39 = vadd.f32 %v852_v33, %v723_v19  ;;  %v818_v15 = vmul.f32 %v1428_v18, %v1428_v18 }
  0xcf   : > { %773 = vst [vmem:[%s1280_s23 + $0x38] sm:$0xff] %v723_v19  ;;  %v827_v41 = vadd.f32 %v826_v35, %v812_v31 }
  0xd0   : > { %v893_v46 = vadd.f32 %v892_v38, %v878_v34 }
  0xd3   : > { %v741_v37 = vpop.f32.mrf.mxu3 }
  0xd4   : > { %779 = vst [vmem:[%s1280_s23 + $0x68] sm:$0xff] %v741_v37  ;;  %v585_v40 = vpop.f32.mrf.mxu0  ;;  %v884_v17 = vmul.f32 %v741_v37, %v741_v37 }
  0xd5   : > { %756 = vst [vmem:[%s1275_s20 + $0x30] sm:$0xff] %v585_v40  ;;  %v788_v42 = vadd.f32 %v787_v36, %v585_v40  ;;  %v813_v43 = vmul.f32 %v585_v40, %v585_v40  ;;  %v603_v44 = vpop.f32.mrf.mxu2  ;;  %v726_v45 = vpop.f32.mrf.mxu1 }
  0xd6   : > { %762 = vst [vmem:[%s1275_s20 + $0x60] sm:$0xff] %v603_v44  ;;  %v854_v48 = vadd.f32 %v853_v39, %v726_v45  ;;  %v879_v50 = vmul.f32 %v726_v45, %v726_v45 }
  0xd7   : > { %v789_v54 = vadd.f32 %v788_v42, %v1388_v49  ;;  %v828_v56 = vadd.f32 %v827_v41, %v813_v43  ;;  %774 = vst [vmem:[%s1280_s23 + $0x40] sm:$0xff] %v726_v45 }
  0xd8   : > { %v855_v60 = vadd.f32 %v854_v48, %v1393_v51  ;;  %v894_v62 = vadd.f32 %v893_v46, %v879_v50 }
  0xd9   : > { %v790_v0 = vadd.f32 %v789_v54, %v1398_v53  ;;  %v829_v1 = vadd.f32 %v828_v56, %v814_v52 }
  0xda   : > { %v856_v49 = vadd.f32 %v855_v60, %v1403_v55  ;;  %v895_v3 = vadd.f32 %v894_v62, %v880_v58  ;;  %v846_v62 = vld [vmem:[#allocation4] sm:$0x1] }
  0xdb   : > { %v791_v5 = vadd.f32 %v790_v0, %v1408_v57  ;;  %v830_v51 = vadd.f32 %v829_v1, %v815_v63  ;;  %v744_v6 = vpop.f32.mrf.mxu3 }
  0xdc   : > { %v857_v53 = vadd.f32 %v856_v49, %v1413_v59  ;;  %v896_v8 = vadd.f32 %v895_v3, %v881_v2  ;;  %780 = vst [vmem:[%s1280_s23 + $0x70] sm:$0xff] %v744_v6  ;;  %v885_v24 = vmul.f32 %v744_v6, %v744_v6  ;;  %v870_v49 = vld [vmem:[#allocation5] sm:$0x1] }
  0xdd   : > { %v831_v55 = vadd.f32 %v830_v51, %v816_v4  ;;  %v792_v11 = vadd.f32 %v791_v5, %v1418_v61  ;;  %v606_v12 = vpop.f32.mrf.mxu2  ;;  %v819_v61 = vmul.f32 %v603_v44, %v603_v44  ;;  %v782_v51 = vld [vmem:[#allocation2] sm:$0x1] }
  0xde   : > { %v897_v57 = vadd.f32 %v896_v8, %v882_v7  ;;  %v858_v14 = vadd.f32 %v857_v53, %v1423_v10  ;;  %763 = vst [vmem:[%s1275_s20 + $0x68] sm:$0xff] %v606_v12  ;;  %v820_v27 = vmul.f32 %v606_v12, %v606_v12  ;;  %v806_v8 = vld [vmem:[#allocation3] sm:$0x1] }
  0xdf   : > { %v793_v59 = vadd.f32 %v792_v11, %v1428_v18  ;;  %v832_v16 = vadd.f32 %v831_v55, %v817_v9 }
  0xe0   : > { %v859_v19 = vadd.f32 %v858_v14, %v741_v37  ;;  %v898_v20 = vadd.f32 %v897_v57, %v883_v13  ;;  %v822_v37 = vmul.f32 %v1383_v47, %v1383_v47 }
  0xe1   : > { %v794_v21 = vadd.f32 %v793_v59, %v603_v44  ;;  %v833_v22 = vadd.f32 %v832_v16, %v818_v15 }
  0xe2   : > { %v860_v23 = vadd.f32 %v859_v19, %v744_v6  ;;  %v899_v25 = vadd.f32 %v898_v20, %v884_v17 }
  0xe3   : > { %v834_v26 = vadd.f32 %v833_v22, %v819_v61  ;;  %v795_v10 = vadd.f32 %v794_v21, %v606_v12  ;;  %v747_v28 = vpop.f32.mrf.mxu3 }
  0xe4   : > { %v900_v29 = vadd.f32 %v899_v25, %v885_v24  ;;  %781 = vst [vmem:[%s1280_s23 + $0x78] sm:$0xff] %v747_v28  ;;  %v861_v30 = vadd.f32 %v860_v23, %v747_v28  ;;  %v886_v18 = vmul.f32 %v747_v28, %v747_v28 }
  0xe5   : > { %v835_v31 = vadd.f32 %v834_v26, %v820_v27  ;;  %v609_v32 = vpop.f32.mrf.mxu2 }
  0xe6   : > { %v862_v33 = vrot.slane %v861_v30, 4  ;;  %v901_v34 = vadd.f32 %v900_v29, %v886_v18  ;;  %764 = vst [vmem:[%s1275_s20 + $0x70] sm:$0xff] %v609_v32  ;;  %v796_v35 = vadd.f32 %v795_v10, %v609_v32  ;;  %v821_v36 = vmul.f32 %v609_v32, %v609_v32 }
  0xe8   : > { %v863_v38 = vadd.f32 %v862_v33, %v861_v30  ;;  %v902_v39 = vrot.slane %v901_v34, 4  ;;  %v797_v40 = vadd.f32 %v796_v35, %v1383_v47  ;;  %v836_v41 = vadd.f32 %v835_v31, %v821_v36 }
  0xea   : > { %v864_v42 = vrot.slane %v863_v38, 2  ;;  %v903_v43 = vadd.f32 %v902_v39, %v901_v34  ;;  %v798_v44 = vrot.slane %v797_v40, 4  ;;  %v837_v45 = vadd.f32 %v836_v41, %v822_v37 }
  0xec   : > { %v865_v46 = vadd.f32 %v864_v42, %v863_v38  ;;  %v904_v48 = vrot.slane %v903_v43, 2  ;;  %v799_v50 = vadd.f32 %v798_v44, %v797_v40  ;;  %v838_v52 = vrot.slane %v837_v45, 4 }
  0xee   : > { %v866_v54 = vrot.slane %v865_v46, 1  ;;  %v905_v56 = vadd.f32 %v904_v48, %v903_v43  ;;  %v800_v58 = vrot.slane %v799_v50, 2  ;;  %v839_v60 = vadd.f32 %v838_v52, %v837_v45 }
  0xf0   : > { %v867_v63 = vadd.f32 %v866_v54, %v865_v46  ;;  %v906_v0 = vrot.slane %v905_v56, 1  ;;  %v801_v1 = vadd.f32 %v800_v58, %v799_v50  ;;  %v840_v2 = vrot.slane %v839_v60, 2 }
  0xf2   : > { %v868_v47 = vadd.f32 %v867_v63, %v846_v62  ;;  %v907_v3 = vadd.f32 %v906_v0, %v905_v56  ;;  %v802_v4 = vrot.slane %v801_v1, 1  ;;  %v841_v5 = vadd.f32 %v840_v2, %v839_v60 }
  0xf4   : > { %869 = vst [vmem:[#allocation4] sm:$0x1] %v868_v47  ;;  %v908_v6 = vadd.f32 %v907_v3, %v870_v49  ;;  %v803_v7 = vadd.f32 %v802_v4, %v801_v1  ;;  %v842_v53 = vrot.slane %v841_v5, 1 }
  0xf6   : > { %909 = vst [vmem:[#allocation5] sm:$0x1] %v908_v6  ;;  %v804_v9 = vadd.f32 %v803_v7, %v782_v51  ;;  %v843_v55 = vadd.f32 %v842_v53, %v841_v5  ;;  %913 = sbr.rel (%p1137_p5) target bundleno = 292 (0x124), region = 60 }
  0xf8   : > { %805 = vst [vmem:[#allocation2] sm:$0x1] %v804_v9  ;;  %v844_v11 = vadd.f32 %v843_v55, %v806_v8 }
  0xfa   : > { %845 = vst [vmem:[#allocation3] sm:$0x1] %v844_v11 }
  0xfb   : > { %v939_v15 = vld [vmem:[#allocation4] sm:$0x1]  ;;  %v921_v34 = vld [vmem:[%s1501_s2] sm:$0x1] }
  0xfc   : > { %v940_v59 = vmul.f32 0.001953125, %v939_v15  ;;  %v946_v36 = vld [vmem:[%s1505_s6] sm:$0x1] }
  0xfd   : > { %v941_v16 = vld [vmem:[#allocation5] sm:$0x1]  ;;  %v935_v41 = vld [vmem:[%s1502_s3] sm:$0x1] }
  0xfe   : > { %v942_v19 = vmul.f32 0.001953125, %v941_v16  ;;  %v943_v20 = vmul.f32 %v940_v59, %v940_v59  ;;  %v960_v44 = vld [vmem:[%s1506_s7] sm:$0x1] }
  0xff   : > { %v914_v12 = vld [vmem:[#allocation2] sm:$0x1] }
 0x100   : > { %v915_v57 = vmul.f32 0.001953125, %v914_v12  ;;  %v944_v61 = vsub.f32 %v942_v19, %v943_v20 }
 0x101   : > { %v916_v13 = vld [vmem:[#allocation3] sm:$0x1] }
 0x102   : > { %v917_v14 = vmul.f32 0.001953125, %v916_v13  ;;  %v918_v17 = vmul.f32 %v915_v57, %v915_v57  ;;  %v945_v23 = vmax.f32 %v944_v61, 0.0 }
 0x104   : > { %v919_v21 = vsub.f32 %v917_v14, %v918_v17  ;;  %v947_v25 = vadd.f32 1e-05, %v945_v23 }
 0x106   : > { %v920_v22 = vmax.f32 %v919_v21, 0.0  ;;  %vm954_vm5 = vweird.f32 %v947_v25 }
 0x108   : > { %v922_v24 = vadd.f32 1e-05, %v920_v22 }
 0x10a   : > { %1168 = vrsqrt.f32 %v922_v24  ;;  %vm929_vm3 = vweird.f32 %v922_v24 }
 0x10b   : > { %1170 = vrsqrt.f32 %v947_v25 }
 0x110   : > { %v1169_v26 = vpop.eup %1168 }
 0x111   : > { %v1171_v10 = vpop.eup %1170  ;;  %v924_v27 = vmul.f32 %v1169_v26, %v922_v24  ;;  %vm930_vm4 = vweird.f32 %v1169_v26 }
 0x112   : > { %v949_v28 = vmul.f32 %v1171_v10, %v947_v25  ;;  %vm955_vm6 = vweird.f32 %v1171_v10  ;;  %vm931_vm7 = vmor %vm929_vm3, %vm930_vm4 }
 0x113   : > { %v925_v29 = vmul.f32 %v1169_v26, %v924_v27  ;;  %vm956_vm8 = vmor %vm954_vm5, %vm955_vm6 }
 0x114   : > { %v950_v30 = vmul.f32 %v1171_v10, %v949_v28 }
 0x115   : > { %v926_v18 = vmul.f32 0.5, %v925_v29 }
 0x116   : > { %v951_v31 = vmul.f32 0.5, %v950_v30 }
 0x117   : > { %v927_v32 = vsub.f32 1.5, %v926_v18 }
 0x118   : > { %v952_v33 = vsub.f32 1.5, %v951_v31 }
 0x119   : > { %v928_v35 = vmul.f32 %v1169_v26, %v927_v32 }
 0x11a   : > { %v953_v37 = vmul.f32 %v1171_v10, %v952_v33 }
 0x11b   : > { %v932_v38 = vsel %vm931_vm7, %v1169_v26, %v928_v35 }
 0x11c   : > { %v933_v39 = vmul.f32 %v932_v38, %v921_v34  ;;  %v957_v40 = vsel %vm956_vm8, %v1171_v10, %v953_v37 }
 0x11d   : > { %v958_v42 = vmul.f32 %v957_v40, %v946_v36 }
 0x11e   : > { %934 = vst [vmem:[%s1509_s10] sm:$0x1] %v933_v39  ;;  %v936_v43 = vmul.f32 %v933_v39, %v915_v57 }
 0x11f   : > { %959 = vst [vmem:[%s1511_s12] sm:$0x1] %v958_v42  ;;  %v961_v45 = vmul.f32 %v958_v42, %v940_v59 }
 0x120   : > { %v937_v46 = vsub.f32 %v935_v41, %v936_v43 }
 0x121   : > { %v962_v48 = vsub.f32 %v960_v44, %v961_v45 }
 0x122   : > { %938 = vst [vmem:[%s1510_s11] sm:$0x1] %v937_v46 }
 0x123   : > { %963 = vst [vmem:[%s1512_s13] sm:$0x1] %v962_v48 }
 0x124 PF: > { %s24_s25 = sadd.s32 1, %s1178_s25  }
 0x125   : > { %p21_p6 = scmp.ge.s32.totalorder %s24_s25, 6  }
 0x127   :  { %23 = sbr.rel (!%p21_p6) target bundleno = 1 (0x1), region = 137 }

</bundles_post_ra>
